<compile_context>
chip_gen: v7x
topology: tpu7x:2x2x1
jax: 0.10.0
libtpu: 0.0.40
codegen_flags: <defaults>
</compile_context>

<pallas_src>
import functools

import jax
import jax.numpy as jnp
from jax import lax
from jax.experimental import pallas as pl
from jax.experimental.pallas import tpu as pltpu


def _pooled_self_attention_kernel(
    gamma_ref,   # SMEM (1, 1) f32
    x_ref,       # (1, 4, HWp, C)  pixels regrouped by 2x2-pool window position
    wt_ref,      # (C,  C8)  theta 1x1-conv weight, transposed
    wp_ref,      # (C,  C8)  phi   1x1-conv weight, transposed
    wg_ref,      # (C,  C2)  g     1x1-conv weight, transposed
    wo_ref,      # (C2, C)   o     1x1-conv weight, transposed
    out_ref,     # (1, 4, HWp, C)
):
    f32 = jnp.float32
    gamma = gamma_ref[0, 0]

    wt = wt_ref[...]
    wp = wp_ref[...]
    wg = wg_ref[...]
    wo = wo_ref[...]

    x0 = x_ref[0, 0]
    x1 = x_ref[0, 1]
    x2 = x_ref[0, 2]
    x3 = x_ref[0, 3]

    def proj(xq, w):
        return jnp.dot(xq, w, preferred_element_type=f32)

    # phi / g 1x1 convs followed by 2x2 max pool.  Because quadrant q of x_ref
    # holds the q-th element of every pooling window, the pool is just an
    # elementwise max over the 4 quadrant projections.
    phi_pool = jnp.maximum(
        jnp.maximum(proj(x0, wp), proj(x1, wp)),
        jnp.maximum(proj(x2, wp), proj(x3, wp)),
    )                                                        # (HWp, C8)
    g_pool = jnp.maximum(
        jnp.maximum(proj(x0, wg), proj(x1, wg)),
        jnp.maximum(proj(x2, wg), proj(x3, wg)),
    )                                                        # (HWp, C2)

    # Attention, one quadrant of query pixels at a time (static unrolled loop).
    for q, xq in enumerate((x0, x1, x2, x3)):
        theta_q = jnp.dot(xq, wt, preferred_element_type=f32)          # (HWp, C8)
        # scores[p, j] = sum_c theta_q[p, c] * phi_pool[j, c]
        s = lax.dot_general(theta_q, phi_pool,
                            (((1,), (1,)), ((), ())),
                            preferred_element_type=f32)                # (HWp, HWp)
        s = s - jnp.max(s, axis=-1, keepdims=True)
        p = jnp.exp(s)
        beta = p / jnp.sum(p, axis=-1, keepdims=True)                  # softmax
        attn = jnp.dot(beta, g_pool, preferred_element_type=f32)       # (HWp, C2)
        o_q = jnp.dot(attn, wo, preferred_element_type=f32)            # (HWp, C)
        out_ref[0, q] = (gamma * o_q + xq.astype(f32)).astype(out_ref.dtype)


@jax.jit
def pooled_self_attention_2d(x, w_theta, w_phi, w_g, w_o, gamma):
    """x: (B, C, H, W) NCHW.  Weights in PyTorch (out_ch, in_ch) layout
    (already spectrally normalized).  gamma: scalar."""
    B, C, H, W = x.shape
    assert C % 8 == 0 and H % 2 == 0 and W % 2 == 0
    C8, C2 = C // 8, C // 2
    Hp, Wp = H // 2, W // 2
    HWp = Hp * Wp

    # --- wrapper-side layout plumbing (free-ish XLA reshapes/transposes) ---
    # x_win[b, q, j, c] = x[b, c, 2*hp + dh, 2*wp + dw], q = 2*dh + dw,
    # j = hp*Wp + wp.
    x_win = (
        x.reshape(B, C, Hp, 2, Wp, 2)
         .transpose(0, 3, 5, 2, 4, 1)
         .reshape(B, 4, HWp, C)
    )
    gamma2d = jnp.asarray(gamma, jnp.float32).reshape(1, 1)

    out_win = pl.pallas_call(
        _pooled_self_attention_kernel,
        out_shape=jax.ShapeDtypeStruct((B, 4, HWp, C), x.dtype),
        grid_spec=pltpu.PrefetchScalarGridSpec(
            num_scalar_prefetch=0,
            grid=(B,),
            in_specs=[
                pl.BlockSpec(memory_space=pltpu.MemorySpace.SMEM),     # gamma
                pl.BlockSpec((1, 4, HWp, C), lambda b: (b, 0, 0, 0)),  # x_win
                pl.BlockSpec((C, C8), lambda b: (0, 0)),               # Wt^T
                pl.BlockSpec((C, C8), lambda b: (0, 0)),               # Wp^T
                pl.BlockSpec((C, C2), lambda b: (0, 0)),               # Wg^T
                pl.BlockSpec((C2, C), lambda b: (0, 0)),               # Wo^T
            ],
            out_specs=pl.BlockSpec((1, 4, HWp, C), lambda b: (b, 0, 0, 0)),
        ),
        compiler_params=pltpu.CompilerParams(
            dimension_semantics=("parallel",),
        ),
    )(
        gamma2d,
        x_win,
        w_theta.T.astype(x.dtype),
        w_phi.T.astype(x.dtype),
        w_g.T.astype(x.dtype),
        w_o.T.astype(x.dtype),
    )

    # Undo the window regrouping back to NCHW.
    out = (
        out_win.reshape(B, 2, 2, Hp, Wp, C)
               .transpose(0, 5, 3, 1, 4, 2)
               .reshape(B, C, H, W)
    )
    return out


def spectral_normalize(w, n_iters=10):
    """Divide by the top singular value (power iteration), mirroring
    torch.nn.utils.spectral_norm at inference.  Pure matmuls."""
    v = jnp.full((w.shape[1],), 1.0 / jnp.sqrt(w.shape[1]), w.dtype)
    u = jnp.zeros((w.shape[0],), w.dtype)
    for _ in range(n_iters):
        u = w @ v
        u = u / (jnp.sqrt(jnp.sum(u * u)) + 1e-12)
        v = w.T @ u
        v = v / (jnp.sqrt(jnp.sum(v * v)) + 1e-12)
    sigma = u @ (w @ v)
    return w / sigma


def reference(x, wt, wp, wg, wo, gamma):
    """Pure-JAX reference mirroring the PyTorch forward."""
    B, C, H, W = x.shape
    C8, C2 = C // 8, C // 2

    def conv1x1(inp, w):
        return jnp.einsum('oc,bchw->bohw', w, inp)

    def maxpool2x2(inp):
        b, co, h, w = inp.shape
        return inp.reshape(b, co, h // 2, 2, w // 2, 2).max(axis=(3, 5))

    theta = conv1x1(x, wt).reshape(B, C8, H * W)
    phi = maxpool2x2(conv1x1(x, wp)).reshape(B, C8, H * W // 4)
    g = maxpool2x2(conv1x1(x, wg)).reshape(B, C2, H * W // 4)
    scores = jnp.einsum('bcp,bcj->bpj', theta, phi)
    beta = jax.nn.softmax(scores, axis=-1)
    o_mid = jnp.einsum('bcj,bpj->bcp', g, beta).reshape(B, C2, H, W)
    o = conv1x1(o_mid, wo)
    return gamma * o + x


if __name__ == "__main__":
    key = jax.random.PRNGKey(0)
    B, C, H, W = 2, 32, 16, 16          # n_channels must be a multiple of 8
    kx, kt, kp, kg, ko = jax.random.split(key, 5)

    x = jax.random.normal(kx, (B, C, H, W), dtype=jnp.float32)

    def init(k, co, ci):                 # kaiming-normal-ish 1x1 conv init
        return jax.random.normal(k, (co, ci), jnp.float32) * jnp.sqrt(2.0 / ci)

    w_theta = spectral_normalize(init(kt, C // 8, C))
    w_phi = spectral_normalize(init(kp, C // 8, C))
    w_g = spectral_normalize(init(kg, C // 2, C))
    w_o = spectral_normalize(init(ko, C, C // 2))
    gamma = jnp.float32(0.75)            # nonzero so the attention path is exercised

    out = pooled_self_attention_2d(x, w_theta, w_phi, w_g, w_o, gamma)
    out = jax.block_until_ready(out)

    ref = reference(x, w_theta, w_phi, w_g, w_o, gamma)
    assert out.shape == x.shape
    err = float(jnp.max(jnp.abs(out - ref)))
    assert err < 5e-2, f"max abs err {err}"

    print("KERNEL_OK")
</pallas_src>

<mosaic_0001>
module attributes {stable_mosaic.version = 11 : i64} {
  func.func @_pooled_self_attention_kernel(%arg0: i32, %arg1: memref<1x1xf32, #tpu.memory_space<smem>>, %arg2: memref<1x4x64x32xf32, #tpu.memory_space<vmem>>, %arg3: memref<32x4xf32, #tpu.memory_space<vmem>>, %arg4: memref<32x4xf32, #tpu.memory_space<vmem>>, %arg5: memref<32x16xf32, #tpu.memory_space<vmem>>, %arg6: memref<16x32xf32, #tpu.memory_space<vmem>>, %arg7: memref<1x4x64x32xf32, #tpu.memory_space<vmem>>) attributes {dimension_semantics = [#tpu.dimension_semantics<parallel>], iteration_bounds = array<i64: 2>, scalar_prefetch = 0 : i64, scratch_operands = 0 : i64, tpu.core_type = #tpu.core_type<tc>, window_params = [{transform_indices = @transform_0, window_bounds = array<i64: 1, 1>}, {transform_indices = @transform_1, window_bounds = array<i64: 1, 4, 64, 32>}, {pipeline_mode = #tpu.pipeline_mode<synchronous>, transform_indices = @transform_2, window_bounds = array<i64: 32, 4>}, {pipeline_mode = #tpu.pipeline_mode<synchronous>, transform_indices = @transform_3, window_bounds = array<i64: 32, 4>}, {pipeline_mode = #tpu.pipeline_mode<synchronous>, transform_indices = @transform_4, window_bounds = array<i64: 32, 16>}, {pipeline_mode = #tpu.pipeline_mode<synchronous>, transform_indices = @transform_5, window_bounds = array<i64: 16, 32>}, {transform_indices = @transform_6, window_bounds = array<i64: 1, 4, 64, 32>}]} {
    %c0 = arith.constant 0 : index
    %c0_0 = arith.constant 0 : index
    %0 = memref.load %arg1[%c0, %c0_0] : memref<1x1xf32, #tpu.memory_space<smem>>
    %c0_1 = arith.constant 0 : index
    %c0_2 = arith.constant 0 : index
    %1 = vector.load %arg3[%c0_1, %c0_2] : memref<32x4xf32, #tpu.memory_space<vmem>>, vector<32x4xf32>
    %c0_3 = arith.constant 0 : index
    %c0_4 = arith.constant 0 : index
    %2 = vector.load %arg4[%c0_3, %c0_4] : memref<32x4xf32, #tpu.memory_space<vmem>>, vector<32x4xf32>
    %c0_5 = arith.constant 0 : index
    %c0_6 = arith.constant 0 : index
    %3 = vector.load %arg5[%c0_5, %c0_6] : memref<32x16xf32, #tpu.memory_space<vmem>>, vector<32x16xf32>
    %c0_7 = arith.constant 0 : index
    %c0_8 = arith.constant 0 : index
    %4 = vector.load %arg6[%c0_7, %c0_8] : memref<16x32xf32, #tpu.memory_space<vmem>>, vector<16x32xf32>
    %c0_9 = arith.constant 0 : index
    %c0_10 = arith.constant 0 : index
    %c0_11 = arith.constant 0 : index
    %c0_12 = arith.constant 0 : index
    %5 = vector.load %arg2[%c0_9, %c0_10, %c0_11, %c0_12] : memref<1x4x64x32xf32, #tpu.memory_space<vmem>>, vector<1x1x64x32xf32>
    %6 = vector.shape_cast %5 : vector<1x1x64x32xf32> to vector<64x32xf32>
    %c0_13 = arith.constant 0 : index
    %c1 = arith.constant 1 : index
    %c0_14 = arith.constant 0 : index
    %c0_15 = arith.constant 0 : index
    %7 = vector.load %arg2[%c0_13, %c1, %c0_14, %c0_15] : memref<1x4x64x32xf32, #tpu.memory_space<vmem>>, vector<1x1x64x32xf32>
    %8 = vector.shape_cast %7 : vector<1x1x64x32xf32> to vector<64x32xf32>
    %c0_16 = arith.constant 0 : index
    %c2 = arith.constant 2 : index
    %c0_17 = arith.constant 0 : index
    %c0_18 = arith.constant 0 : index
    %9 = vector.load %arg2[%c0_16, %c2, %c0_17, %c0_18] : memref<1x4x64x32xf32, #tpu.memory_space<vmem>>, vector<1x1x64x32xf32>
    %10 = vector.shape_cast %9 : vector<1x1x64x32xf32> to vector<64x32xf32>
    %c0_19 = arith.constant 0 : index
    %c3 = arith.constant 3 : index
    %c0_20 = arith.constant 0 : index
    %c0_21 = arith.constant 0 : index
    %11 = vector.load %arg2[%c0_19, %c3, %c0_20, %c0_21] : memref<1x4x64x32xf32, #tpu.memory_space<vmem>>, vector<1x1x64x32xf32>
    %12 = vector.shape_cast %11 : vector<1x1x64x32xf32> to vector<64x32xf32>
    %cst = arith.constant dense<0.000000e+00> : vector<64x4xf32>
    %13 = tpu.matmul %6, %2, %cst {dimension_numbers = #tpu.dot_dimension_numbers<[1], [0], [0], [1], [0, 0, 1, 1], [], []>} : vector<64x32xf32>, vector<32x4xf32>, vector<64x4xf32> -> vector<64x4xf32>
    %cst_22 = arith.constant dense<0.000000e+00> : vector<64x4xf32>
    %14 = tpu.matmul %8, %2, %cst_22 {dimension_numbers = #tpu.dot_dimension_numbers<[1], [0], [0], [1], [0, 0, 1, 1], [], []>} : vector<64x32xf32>, vector<32x4xf32>, vector<64x4xf32> -> vector<64x4xf32>
    %15 = arith.maximumf %13, %14 : vector<64x4xf32>
    %cst_23 = arith.constant dense<0.000000e+00> : vector<64x4xf32>
    %16 = tpu.matmul %10, %2, %cst_23 {dimension_numbers = #tpu.dot_dimension_numbers<[1], [0], [0], [1], [0, 0, 1, 1], [], []>} : vector<64x32xf32>, vector<32x4xf32>, vector<64x4xf32> -> vector<64x4xf32>
    %cst_24 = arith.constant dense<0.000000e+00> : vector<64x4xf32>
    %17 = tpu.matmul %12, %2, %cst_24 {dimension_numbers = #tpu.dot_dimension_numbers<[1], [0], [0], [1], [0, 0, 1, 1], [], []>} : vector<64x32xf32>, vector<32x4xf32>, vector<64x4xf32> -> vector<64x4xf32>
    %18 = arith.maximumf %16, %17 : vector<64x4xf32>
    %19 = arith.maximumf %15, %18 : vector<64x4xf32>
    %cst_25 = arith.constant dense<0.000000e+00> : vector<64x16xf32>
    %20 = tpu.matmul %6, %3, %cst_25 {dimension_numbers = #tpu.dot_dimension_numbers<[1], [0], [0], [1], [0, 0, 1, 1], [], []>} : vector<64x32xf32>, vector<32x16xf32>, vector<64x16xf32> -> vector<64x16xf32>
    %cst_26 = arith.constant dense<0.000000e+00> : vector<64x16xf32>
    %21 = tpu.matmul %8, %3, %cst_26 {dimension_numbers = #tpu.dot_dimension_numbers<[1], [0], [0], [1], [0, 0, 1, 1], [], []>} : vector<64x32xf32>, vector<32x16xf32>, vector<64x16xf32> -> vector<64x16xf32>
    %22 = arith.maximumf %20, %21 : vector<64x16xf32>
    %cst_27 = arith.constant dense<0.000000e+00> : vector<64x16xf32>
    %23 = tpu.matmul %10, %3, %cst_27 {dimension_numbers = #tpu.dot_dimension_numbers<[1], [0], [0], [1], [0, 0, 1, 1], [], []>} : vector<64x32xf32>, vector<32x16xf32>, vector<64x16xf32> -> vector<64x16xf32>
    %cst_28 = arith.constant dense<0.000000e+00> : vector<64x16xf32>
    %24 = tpu.matmul %12, %3, %cst_28 {dimension_numbers = #tpu.dot_dimension_numbers<[1], [0], [0], [1], [0, 0, 1, 1], [], []>} : vector<64x32xf32>, vector<32x16xf32>, vector<64x16xf32> -> vector<64x16xf32>
    %25 = arith.maximumf %23, %24 : vector<64x16xf32>
    %26 = arith.maximumf %22, %25 : vector<64x16xf32>
    %cst_29 = arith.constant dense<0.000000e+00> : vector<64x4xf32>
    %27 = tpu.matmul %6, %1, %cst_29 {dimension_numbers = #tpu.dot_dimension_numbers<[1], [0], [0], [1], [0, 0, 1, 1], [], []>} : vector<64x32xf32>, vector<32x4xf32>, vector<64x4xf32> -> vector<64x4xf32>
    %cst_30 = arith.constant dense<0.000000e+00> : vector<64x64xf32>
    %28 = tpu.matmul %27, %19, %cst_30 {dimension_numbers = #tpu.dot_dimension_numbers<[1], [1], [0], [0], [0, 0, 1, 0], [], []>} : vector<64x4xf32>, vector<64x4xf32>, vector<64x64xf32> -> vector<64x64xf32>
    %cst_31 = arith.constant dense<0xFF800000> : vector<64xf32>
    %29 = vector.multi_reduction <maximumf>, %28, %cst_31 [1] : vector<64x64xf32> to vector<64xf32>
    %30 = vector.shape_cast %29 : vector<64xf32> to vector<64x1xf32>
    %31 = vector.broadcast %30 : vector<64x1xf32> to vector<64x64xf32>
    %32 = arith.subf %28, %31 : vector<64x64xf32>
    %33 = math.exp %32 : vector<64x64xf32>
    %cst_32 = arith.constant dense<0.000000e+00> : vector<64xf32>
    %34 = vector.multi_reduction <add>, %33, %cst_32 [1] : vector<64x64xf32> to vector<64xf32>
    %35 = vector.shape_cast %34 : vector<64xf32> to vector<64x1xf32>
    %36 = vector.broadcast %35 : vector<64x1xf32> to vector<64x64xf32>
    %37 = arith.divf %33, %36 : vector<64x64xf32>
    %cst_33 = arith.constant dense<0.000000e+00> : vector<64x16xf32>
    %38 = tpu.matmul %37, %26, %cst_33 {dimension_numbers = #tpu.dot_dimension_numbers<[1], [0], [0], [1], [0, 0, 1, 1], [], []>} : vector<64x64xf32>, vector<64x16xf32>, vector<64x16xf32> -> vector<64x16xf32>
    %cst_34 = arith.constant dense<0.000000e+00> : vector<64x32xf32>
    %39 = tpu.matmul %38, %4, %cst_34 {dimension_numbers = #tpu.dot_dimension_numbers<[1], [0], [0], [1], [0, 0, 1, 1], [], []>} : vector<64x16xf32>, vector<16x32xf32>, vector<64x32xf32> -> vector<64x32xf32>
    %40 = vector.broadcast %0 : f32 to vector<64x32xf32>
    %41 = arith.mulf %40, %39 : vector<64x32xf32>
    %42 = arith.addf %41, %6 : vector<64x32xf32>
    %c0_35 = arith.constant 0 : index
    %c0_36 = arith.constant 0 : index
    %c0_37 = arith.constant 0 : index
    %c0_38 = arith.constant 0 : index
    %43 = vector.load %arg7[%c0_35, %c0_36, %c0_37, %c0_38] : memref<1x4x64x32xf32, #tpu.memory_space<vmem>>, vector<1x1x64x32xf32>
    %44 = vector.shape_cast %43 : vector<1x1x64x32xf32> to vector<64x32xf32>
    %45 = vector.shape_cast %42 : vector<64x32xf32> to vector<1x1x64x32xf32>
    tpu.vector_store %arg7[%c0_35, %c0_36, %c0_37, %c0_38], %45 {strides = array<i32>} : memref<1x4x64x32xf32, #tpu.memory_space<vmem>>, vector<1x1x64x32xf32>,
    %cst_39 = arith.constant dense<0.000000e+00> : vector<64x4xf32>
    %46 = tpu.matmul %8, %1, %cst_39 {dimension_numbers = #tpu.dot_dimension_numbers<[1], [0], [0], [1], [0, 0, 1, 1], [], []>} : vector<64x32xf32>, vector<32x4xf32>, vector<64x4xf32> -> vector<64x4xf32>
    %cst_40 = arith.constant dense<0.000000e+00> : vector<64x64xf32>
    %47 = tpu.matmul %46, %19, %cst_40 {dimension_numbers = #tpu.dot_dimension_numbers<[1], [1], [0], [0], [0, 0, 1, 0], [], []>} : vector<64x4xf32>, vector<64x4xf32>, vector<64x64xf32> -> vector<64x64xf32>
    %cst_41 = arith.constant dense<0xFF800000> : vector<64xf32>
    %48 = vector.multi_reduction <maximumf>, %47, %cst_41 [1] : vector<64x64xf32> to vector<64xf32>
    %49 = vector.shape_cast %48 : vector<64xf32> to vector<64x1xf32>
    %50 = vector.broadcast %49 : vector<64x1xf32> to vector<64x64xf32>
    %51 = arith.subf %47, %50 : vector<64x64xf32>
    %52 = math.exp %51 : vector<64x64xf32>
    %cst_42 = arith.constant dense<0.000000e+00> : vector<64xf32>
    %53 = vector.multi_reduction <add>, %52, %cst_42 [1] : vector<64x64xf32> to vector<64xf32>
    %54 = vector.shape_cast %53 : vector<64xf32> to vector<64x1xf32>
    %55 = vector.broadcast %54 : vector<64x1xf32> to vector<64x64xf32>
    %56 = arith.divf %52, %55 : vector<64x64xf32>
    %cst_43 = arith.constant dense<0.000000e+00> : vector<64x16xf32>
    %57 = tpu.matmul %56, %26, %cst_43 {dimension_numbers = #tpu.dot_dimension_numbers<[1], [0], [0], [1], [0, 0, 1, 1], [], []>} : vector<64x64xf32>, vector<64x16xf32>, vector<64x16xf32> -> vector<64x16xf32>
    %cst_44 = arith.constant dense<0.000000e+00> : vector<64x32xf32>
    %58 = tpu.matmul %57, %4, %cst_44 {dimension_numbers = #tpu.dot_dimension_numbers<[1], [0], [0], [1], [0, 0, 1, 1], [], []>} : vector<64x16xf32>, vector<16x32xf32>, vector<64x32xf32> -> vector<64x32xf32>
    %59 = vector.broadcast %0 : f32 to vector<64x32xf32>
    %60 = arith.mulf %59, %58 : vector<64x32xf32>
    %61 = arith.addf %60, %8 : vector<64x32xf32>
    %c0_45 = arith.constant 0 : index
    %c1_46 = arith.constant 1 : index
    %c0_47 = arith.constant 0 : index
    %c0_48 = arith.constant 0 : index
    %62 = vector.load %arg7[%c0_45, %c1_46, %c0_47, %c0_48] : memref<1x4x64x32xf32, #tpu.memory_space<vmem>>, vector<1x1x64x32xf32>
    %63 = vector.shape_cast %62 : vector<1x1x64x32xf32> to vector<64x32xf32>
    %64 = vector.shape_cast %61 : vector<64x32xf32> to vector<1x1x64x32xf32>
    tpu.vector_store %arg7[%c0_45, %c1_46, %c0_47, %c0_48], %64 {strides = array<i32>} : memref<1x4x64x32xf32, #tpu.memory_space<vmem>>, vector<1x1x64x32xf32>,
    %cst_49 = arith.constant dense<0.000000e+00> : vector<64x4xf32>
    %65 = tpu.matmul %10, %1, %cst_49 {dimension_numbers = #tpu.dot_dimension_numbers<[1], [0], [0], [1], [0, 0, 1, 1], [], []>} : vector<64x32xf32>, vector<32x4xf32>, vector<64x4xf32> -> vector<64x4xf32>
    %cst_50 = arith.constant dense<0.000000e+00> : vector<64x64xf32>
    %66 = tpu.matmul %65, %19, %cst_50 {dimension_numbers = #tpu.dot_dimension_numbers<[1], [1], [0], [0], [0, 0, 1, 0], [], []>} : vector<64x4xf32>, vector<64x4xf32>, vector<64x64xf32> -> vector<64x64xf32>
    %cst_51 = arith.constant dense<0xFF800000> : vector<64xf32>
    %67 = vector.multi_reduction <maximumf>, %66, %cst_51 [1] : vector<64x64xf32> to vector<64xf32>
    %68 = vector.shape_cast %67 : vector<64xf32> to vector<64x1xf32>
    %69 = vector.broadcast %68 : vector<64x1xf32> to vector<64x64xf32>
    %70 = arith.subf %66, %69 : vector<64x64xf32>
    %71 = math.exp %70 : vector<64x64xf32>
    %cst_52 = arith.constant dense<0.000000e+00> : vector<64xf32>
    %72 = vector.multi_reduction <add>, %71, %cst_52 [1] : vector<64x64xf32> to vector<64xf32>
    %73 = vector.shape_cast %72 : vector<64xf32> to vector<64x1xf32>
    %74 = vector.broadcast %73 : vector<64x1xf32> to vector<64x64xf32>
    %75 = arith.divf %71, %74 : vector<64x64xf32>
    %cst_53 = arith.constant dense<0.000000e+00> : vector<64x16xf32>
    %76 = tpu.matmul %75, %26, %cst_53 {dimension_numbers = #tpu.dot_dimension_numbers<[1], [0], [0], [1], [0, 0, 1, 1], [], []>} : vector<64x64xf32>, vector<64x16xf32>, vector<64x16xf32> -> vector<64x16xf32>
    %cst_54 = arith.constant dense<0.000000e+00> : vector<64x32xf32>
    %77 = tpu.matmul %76, %4, %cst_54 {dimension_numbers = #tpu.dot_dimension_numbers<[1], [0], [0], [1], [0, 0, 1, 1], [], []>} : vector<64x16xf32>, vector<16x32xf32>, vector<64x32xf32> -> vector<64x32xf32>
    %78 = vector.broadcast %0 : f32 to vector<64x32xf32>
    %79 = arith.mulf %78, %77 : vector<64x32xf32>
    %80 = arith.addf %79, %10 : vector<64x32xf32>
    %c0_55 = arith.constant 0 : index
    %c2_56 = arith.constant 2 : index
    %c0_57 = arith.constant 0 : index
    %c0_58 = arith.constant 0 : index
    %81 = vector.load %arg7[%c0_55, %c2_56, %c0_57, %c0_58] : memref<1x4x64x32xf32, #tpu.memory_space<vmem>>, vector<1x1x64x32xf32>
    %82 = vector.shape_cast %81 : vector<1x1x64x32xf32> to vector<64x32xf32>
    %83 = vector.shape_cast %80 : vector<64x32xf32> to vector<1x1x64x32xf32>
    tpu.vector_store %arg7[%c0_55, %c2_56, %c0_57, %c0_58], %83 {strides = array<i32>} : memref<1x4x64x32xf32, #tpu.memory_space<vmem>>, vector<1x1x64x32xf32>,
    %cst_59 = arith.constant dense<0.000000e+00> : vector<64x4xf32>
    %84 = tpu.matmul %12, %1, %cst_59 {dimension_numbers = #tpu.dot_dimension_numbers<[1], [0], [0], [1], [0, 0, 1, 1], [], []>} : vector<64x32xf32>, vector<32x4xf32>, vector<64x4xf32> -> vector<64x4xf32>
    %cst_60 = arith.constant dense<0.000000e+00> : vector<64x64xf32>
    %85 = tpu.matmul %84, %19, %cst_60 {dimension_numbers = #tpu.dot_dimension_numbers<[1], [1], [0], [0], [0, 0, 1, 0], [], []>} : vector<64x4xf32>, vector<64x4xf32>, vector<64x64xf32> -> vector<64x64xf32>
    %cst_61 = arith.constant dense<0xFF800000> : vector<64xf32>
    %86 = vector.multi_reduction <maximumf>, %85, %cst_61 [1] : vector<64x64xf32> to vector<64xf32>
    %87 = vector.shape_cast %86 : vector<64xf32> to vector<64x1xf32>
    %88 = vector.broadcast %87 : vector<64x1xf32> to vector<64x64xf32>
    %89 = arith.subf %85, %88 : vector<64x64xf32>
    %90 = math.exp %89 : vector<64x64xf32>
    %cst_62 = arith.constant dense<0.000000e+00> : vector<64xf32>
    %91 = vector.multi_reduction <add>, %90, %cst_62 [1] : vector<64x64xf32> to vector<64xf32>
    %92 = vector.shape_cast %91 : vector<64xf32> to vector<64x1xf32>
    %93 = vector.broadcast %92 : vector<64x1xf32> to vector<64x64xf32>
    %94 = arith.divf %90, %93 : vector<64x64xf32>
    %cst_63 = arith.constant dense<0.000000e+00> : vector<64x16xf32>
    %95 = tpu.matmul %94, %26, %cst_63 {dimension_numbers = #tpu.dot_dimension_numbers<[1], [0], [0], [1], [0, 0, 1, 1], [], []>} : vector<64x64xf32>, vector<64x16xf32>, vector<64x16xf32> -> vector<64x16xf32>
    %cst_64 = arith.constant dense<0.000000e+00> : vector<64x32xf32>
    %96 = tpu.matmul %95, %4, %cst_64 {dimension_numbers = #tpu.dot_dimension_numbers<[1], [0], [0], [1], [0, 0, 1, 1], [], []>} : vector<64x16xf32>, vector<16x32xf32>, vector<64x32xf32> -> vector<64x32xf32>
    %97 = vector.broadcast %0 : f32 to vector<64x32xf32>
    %98 = arith.mulf %97, %96 : vector<64x32xf32>
    %99 = arith.addf %98, %12 : vector<64x32xf32>
    %c0_65 = arith.constant 0 : index
    %c3_66 = arith.constant 3 : index
    %c0_67 = arith.constant 0 : index
    %c0_68 = arith.constant 0 : index
    %100 = vector.load %arg7[%c0_65, %c3_66, %c0_67, %c0_68] : memref<1x4x64x32xf32, #tpu.memory_space<vmem>>, vector<1x1x64x32xf32>
    %101 = vector.shape_cast %100 : vector<1x1x64x32xf32> to vector<64x32xf32>
    %102 = vector.shape_cast %99 : vector<64x32xf32> to vector<1x1x64x32xf32>
    tpu.vector_store %arg7[%c0_65, %c3_66, %c0_67, %c0_68], %102 {strides = array<i32>} : memref<1x4x64x32xf32, #tpu.memory_space<vmem>>, vector<1x1x64x32xf32>,
    return
  }
  func.func @transform_0(%arg0: i32) -> (i32, i32) {
    %c0_i32 = arith.constant 0 : i32
    %c0_i32_0 = arith.constant 0 : i32
    %c0_i32_1 = arith.constant 0 : i32
    return %c0_i32, %c0_i32_0 : i32, i32
  }
  func.func @transform_1(%arg0: i32) -> (i32, i32, i32, i32) {
    %c0_i32 = arith.constant 0 : i32
    %c0_i32_0 = arith.constant 0 : i32
    %c0_i32_1 = arith.constant 0 : i32
    %c0_i32_2 = arith.constant 0 : i32
    return %arg0, %c0_i32, %c0_i32_0, %c0_i32_1 : i32, i32, i32, i32
  }
  func.func @transform_2(%arg0: i32) -> (i32, i32) {
    %c0_i32 = arith.constant 0 : i32
    %c0_i32_0 = arith.constant 0 : i32
    %c0_i32_1 = arith.constant 0 : i32
    return %c0_i32, %c0_i32_0 : i32, i32
  }
  func.func @transform_3(%arg0: i32) -> (i32, i32) {
    %c0_i32 = arith.constant 0 : i32
    %c0_i32_0 = arith.constant 0 : i32
    %c0_i32_1 = arith.constant 0 : i32
    return %c0_i32, %c0_i32_0 : i32, i32
  }
  func.func @transform_4(%arg0: i32) -> (i32, i32) {
    %c0_i32 = arith.constant 0 : i32
    %c0_i32_0 = arith.constant 0 : i32
    %c0_i32_1 = arith.constant 0 : i32
    return %c0_i32, %c0_i32_0 : i32, i32
  }
  func.func @transform_5(%arg0: i32) -> (i32, i32) {
    %c0_i32 = arith.constant 0 : i32
    %c0_i32_0 = arith.constant 0 : i32
    %c0_i32_1 = arith.constant 0 : i32
    return %c0_i32, %c0_i32_0 : i32, i32
  }
  func.func @transform_6(%arg0: i32) -> (i32, i32, i32, i32) {
    %c0_i32 = arith.constant 0 : i32
    %c0_i32_0 = arith.constant 0 : i32
    %c0_i32_1 = arith.constant 0 : i32
    %c0_i32_2 = arith.constant 0 : i32
    return %arg0, %c0_i32, %c0_i32_0, %c0_i32_1 : i32, i32, i32, i32
  }
}

</mosaic_0001>

<bundles_post_ra>
// kernel: pooled_self_attention_2d.1
= control target key start
LH: loop header
LB: loop body
LE: loop exit
PB: predicated region body
PF: predicated region fallthrough
CT: control target
= control target key end

     0   :  { %s5396_s23 = smov 0   ;;  %s6246_s0 = inlined_call_operand.<no memory space> [shape: f32[1,1], index: 0, kind: input, shape index: {}]   ;;  %s6247_s1 = inlined_call_operand.vmem [shape: f32[2,4,64,32], index: 1, kind: input, shape index: {}]   ;;  %s6248_s2 = inlined_call_operand.vmem [shape: f32[32,4], index: 2, kind: input, shape index: {}]   ;;  %s6249_s3 = inlined_call_operand.vmem [shape: f32[32,4], index: 3, kind: input, shape index: {}]   ;;  %s6250_s4 = inlined_call_operand.vmem [shape: f32[32,16], index: 4, kind: input, shape index: {}]   ;;  %s6251_s5 = inlined_call_operand.vmem [shape: f32[16,32], index: 5, kind: input, shape index: {}]   ;;  %s6252_s6 = inlined_call_operand.vmem [shape: f32[2,4,64,32], index: 6, kind: output, shape index: {}]  }
   0x1   :  { %11 = sst [smem:[#allocation2]] %s6246_s0 }
   0x2 LB: > { %s3790_s24 = sadd.s32 4294967295, %s5356_s23   ;;  %p3794_p0 = scmp.ge.s32.totalorder %s5356_s23, 1  ;;  %s5356_s23 = sphi %s5396_s23, %s17_s23  }
   0x3   : > { %p213_p1 = scmp.lt.s32.totalorder %s5356_s23, 3 }
   0x5   : > { %p214_p2 = pnand %p3794_p0, %p213_p1 }
   0x6   : > { %v258_v0 = vld [vmem:[%s6249_s3] sm:$0xff] (!%p214_p2)  ;;  %v259_v1 = vld [vmem:[%s6249_s3 + $0x8] sm:$0xff] (!%p214_p2)  ;;  %v260_v2 = vld [vmem:[%s6249_s3 + $0x10] sm:$0xff] (!%p214_p2)  ;;  %p243_p3 = scmp.lt.s32.totalorder (!%p214_p2), %s3790_s24, 1  ;;  %vm303_vm0 = vcmask (!%p214_p2), 261120   ;;  %vm1393_vm1 = vcmask (!%p214_p2), 31744  }
   0x7   : > { %217 = sbr.rel (%p214_p2) target bundleno = 3594 (0xe0a), region = 44  ;;  %v4915_v3 = vpack.c.bf16 (!%p214_p2), %v259_v1, %v258_v0  ;;  %v261_v4 = vld [vmem:[%s6249_s3 + $0x18] sm:$0xff] (!%p214_p2)  ;;  %v262_v12 = vld [vmem:[%s6250_s4] sm:$0xff] (!%p214_p2)  ;;  %v263_v13 = vld [vmem:[%s6250_s4 + $0x8] sm:$0xff] (!%p214_p2)  ;;  %vm1547_vm3 = vcmask (!%p214_p2), 523264   ;;  %vm1765_vm4 = vcmask (!%p214_p2), 130048  }
   0x8   : > { %v4919_v5 = vpack.c.bf16 (!%p214_p2), %v261_v4, %v260_v2  ;;  %v5474_v18 = vpack.c.bf16 (!%p214_p2), %v263_v13, %v262_v12  ;;  %v264_v27 = vld [vmem:[%s6250_s4 + $0x10] sm:$0xff] (!%p214_p2)  ;;  %v265_v28 = vld [vmem:[%s6250_s4 + $0x18] sm:$0xff] (!%p214_p2)  ;;  %v254_v44 = vld [vmem:[%s6248_s2] sm:$0xff] (!%p214_p2)  ;;  %s253_s10 = sld [smem:[#allocation2]] (!%p214_p2) }
   0x9   : > { %4916 = vmatprep.subr.bf16.mxu0 (!%p214_p2), %v4915_v3  ;;  %4924 = vmatprep.subr.bf16.mxu1 (!%p214_p2), %v4915_v3  ;;  %v4951_v32 = vpack.c.bf16 (!%p214_p2), %v265_v28, %v264_v27  ;;  %v255_v45 = vld [vmem:[%s6248_s2 + $0x8] sm:$0xff] (!%p214_p2)  ;;  %v256_v47 = vld [vmem:[%s6248_s2 + $0x10] sm:$0xff] (!%p214_p2)  ;;  %v257_v48 = vld [vmem:[%s6248_s2 + $0x18] sm:$0xff] (!%p214_p2) }
   0xa   : > { %4918 = vmatpush3.bf16.msra.mxu0 (!%p214_p2), %v4915_v3  ;;  %4926 = vmatpush3.bf16.msra.mxu1 (!%p214_p2), %v4915_v3  ;;  %v5617_v46 = vpack.c.bf16 (!%p214_p2), %v255_v45, %v254_v44  ;;  %v5650_v49 = vpack.c.bf16 (!%p214_p2), %v257_v48, %v256_v47  ;;  %vm5698_vm2 = vmpackc.low (!%p214_p2), %vm1393_vm1, %vm1393_vm1 }
   0xb   : > { %4920 = vmatprep.subr.bf16.mxu0 (!%p214_p2), %v4919_v5  ;;  %4928 = vmatprep.subr.bf16.mxu1 (!%p214_p2), %v4919_v5 }
   0xe   : > { %s6256_s24 = smov (!%p243_p3, %s3790_s24), 1  ;;  %4922 = vmatpush3.bf16.msra.mxu0 %v4919_v5  ;;  %4930 = vmatpush3.bf16.msra.mxu1 %v4919_v5 }
   0xf   : > { %s4073_s8 = sshll.u32 %s6256_s24, 8  ;;  %4932 = vmatprep.subr.bf16.mxu0 %v4915_v3  ;;  %4940 = vmatprep.subr.bf16.mxu1 %v4915_v3 }
  0x10   : > { %s5424_s11 = scalar_lea.vmem %s6247_s1, %s4073_s8  ;;  %s5898_s14 = scalar_lea.vmem %s6252_s6, %s4073_s8 }
  0x11   : > { %v5427_v6 = vld [vmem:[%s5424_s11] sm:$0xff]  ;;  %v5437_v8 = vld [vmem:[%s5424_s11 + $0x8] sm:$0xff]  ;;  %v5443_v10 = vld [vmem:[%s5424_s11 + $0x10] sm:$0xff] }
  0x12   : > { %v5430_v7 = vld [vmem:[%s5424_s11 + $0x40] sm:$0xff]  ;;  %4395 = vmatprep.mubr.msk.f32.mxu0 %vm303_vm0, %v5427_v6  ;;  %v5440_v9 = vld [vmem:[%s5424_s11 + $0x48] sm:$0xff]  ;;  %v5446_v11 = vld [vmem:[%s5424_s11 + $0x50] sm:$0xff] }
  0x13   : > { %4415 = vmatprep.mubr.msk.f32.mxu1 %vm303_vm0, %v5430_v7  ;;  %4396 = vmatmul.mubr.msk.f32.vlgmr.msra.gmra.mrb[0].mxu0 %vm303_vm0, %v5437_v8  ;;  %v5461_v14 = vld [vmem:[%s5424_s11 + $0x18] sm:$0xff]  ;;  %v5469_v16 = vld [vmem:[%s5424_s11 + $0x20] sm:$0xff]  ;;  %v5485_v19 = vld [vmem:[%s5424_s11 + $0x28] sm:$0xff] }
  0x14   : > { %4416 = vmatmul.mubr.msk.f32.vlgmr.msra.gmra.mrb[0].mxu1 %vm303_vm0, %v5440_v9  ;;  %4934 = vmatpush3.bf16.msra.mxu0 %v4915_v3  ;;  %v5464_v15 = vld [vmem:[%s5424_s11 + $0x58] sm:$0xff]  ;;  %v5472_v17 = vld [vmem:[%s5424_s11 + $0x60] sm:$0xff]  ;;  %v5488_v20 = vld [vmem:[%s5424_s11 + $0x68] sm:$0xff] }
  0x15   : > { %4398 = vmatprep.mubr.msk.f32.mxu0 %vm303_vm0, %v5443_v10  ;;  %4418 = vmatprep.mubr.msk.f32.mxu1 %vm303_vm0, %v5446_v11  ;;  %v5491_v21 = vld [vmem:[%s5424_s11 + $0x30] sm:$0xff]  ;;  %v5506_v23 = vld [vmem:[%s5424_s11 + $0x38] sm:$0xff]  ;;  %v5512_v25 = vld [vmem:[%s5424_s11 + $0x80] sm:$0xff] }
  0x16   : > { %4936 = vmatprep.subr.bf16.mxu0 %v4919_v5  ;;  %4942 = vmatpush3.bf16.msra.mxu1 %v4915_v3  ;;  %v5494_v22 = vld [vmem:[%s5424_s11 + $0x70] sm:$0xff]  ;;  %v5509_v24 = vld [vmem:[%s5424_s11 + $0x78] sm:$0xff]  ;;  %v5515_v26 = vld [vmem:[%s5424_s11 + $0xc0] sm:$0xff] }
  0x17   : > { %4399 = vmatmul.mubr.msk.f32.gmra.mrb[2].mxu0 %vm303_vm0, %v5461_v14  ;;  %4944 = vmatprep.subr.bf16.mxu1 %v4919_v5  ;;  %v5533_v29 = vld [vmem:[%s5424_s11 + $0x88] sm:$0xff]  ;;  %v5539_v31 = vld [vmem:[%s5424_s11 + $0x90] sm:$0xff]  ;;  %v5552_v34 = vld [vmem:[%s5424_s11 + $0x98] sm:$0xff] }
  0x18   : > { %4419 = vmatmul.mubr.msk.f32.gmra.mrb[2].mxu1 %vm303_vm0, %v5464_v15  ;;  %4401 = vmatprep.mubr.msk.f32.mxu0 %vm303_vm0, %v5469_v16  ;;  %v5536_v30 = vld [vmem:[%s5424_s11 + $0xc8] sm:$0xff]  ;;  %v5542_v33 = vld [vmem:[%s5424_s11 + $0xd0] sm:$0xff]  ;;  %v5555_v35 = vld [vmem:[%s5424_s11 + $0xd8] sm:$0xff] }
  0x19   : > { %4421 = vmatprep.mubr.msk.f32.mxu1 %vm303_vm0, %v5472_v17  ;;  %4938 = vmatpush3.bf16.msra.mxu0 %v4919_v5  ;;  %v5560_v36 = vld [vmem:[%s5424_s11 + $0xa0] sm:$0xff]  ;;  %v5575_v38 = vld [vmem:[%s5424_s11 + $0xa8] sm:$0xff]  ;;  %v5579_v40 = vld [vmem:[%s5424_s11 + $0xb0] sm:$0xff] }
  0x1a   : > { %4946 = vmatpush3.bf16.msra.mxu1 %v4919_v5  ;;  %4948 = vmatprep.subr.bf16.mxu0 %v5474_v18  ;;  %v5563_v37 = vld [vmem:[%s5424_s11 + $0xe0] sm:$0xff]  ;;  %v3820_v39 = vld [vmem:[%s5424_s11 + $0xe8] sm:$0xff]  ;;  %v3821_v41 = vld [vmem:[%s5424_s11 + $0xf0] sm:$0xff] }
  0x1b   : > { %4402 = vmatmul.mubr.msk.f32.gmra.mrb[4].mxu0 %vm303_vm0, %v5485_v19  ;;  %4956 = vmatprep.subr.bf16.mxu1 %v5474_v18  ;;  %v5590_v42 = vld [vmem:[%s5424_s11 + $0xb8] sm:$0xff] }
  0x1c   : > { %4422 = vmatmul.mubr.msk.f32.gmra.mrb[4].mxu1 %vm303_vm0, %v5488_v20  ;;  %4404 = vmatprep.mubr.msk.f32.mxu0 %vm303_vm0, %v5491_v21  ;;  %v3822_v43 = vld [vmem:[%s5424_s11 + $0xf8] sm:$0xff] }
  0x1d   : > { %4424 = vmatprep.mubr.msk.f32.mxu1 %vm303_vm0, %v5494_v22 }
  0x1f   : > { %4405 = vmatmul.mubr.msk.f32.gmra.mrb[6].mxu0 %vm303_vm0, %v5506_v23 }
  0x20   : > { %4425 = vmatmul.mubr.msk.f32.gmra.mrb[6].mxu1 %vm303_vm0, %v5509_v24  ;;  %4435 = vmatprep.mubr.msk.f32.mxu0 %vm303_vm0, %v5512_v25 }
  0x21   : > { %4455 = vmatprep.mubr.msk.f32.mxu1 %vm303_vm0, %v5515_v26 }
  0x23   : > { %4436 = vmatmul.mubr.msk.f32.vlgmr.msra.gmra.mrb[8].mxu0 %vm303_vm0, %v5533_v29 }
  0x24   : > { %4456 = vmatmul.mubr.msk.f32.vlgmr.msra.gmra.mrb[8].mxu1 %vm303_vm0, %v5536_v30  ;;  %4950 = vmatpush3.bf16.msra.mxu0 %v5474_v18 }
  0x25   : > { %4438 = vmatprep.mubr.msk.f32.mxu0 %vm303_vm0, %v5539_v31  ;;  %4458 = vmatprep.mubr.msk.f32.mxu1 %vm303_vm0, %v5542_v33 }
  0x26   : > { %4952 = vmatprep.subr.bf16.mxu0 %v4951_v32  ;;  %4958 = vmatpush3.bf16.msra.mxu1 %v5474_v18 }
  0x27   : > { %4439 = vmatmul.mubr.msk.f32.gmra.mrb[10].mxu0 %vm303_vm0, %v5552_v34  ;;  %4960 = vmatprep.subr.bf16.mxu1 %v4951_v32 }
  0x28   : > { %4459 = vmatmul.mubr.msk.f32.gmra.mrb[10].mxu1 %vm303_vm0, %v5555_v35  ;;  %4441 = vmatprep.mubr.msk.f32.mxu0 %vm303_vm0, %v5560_v36 }
  0x29   : > { %4461 = vmatprep.mubr.msk.f32.mxu1 %vm303_vm0, %v5563_v37  ;;  %4954 = vmatpush3.bf16.msra.mxu0 %v4951_v32 }
  0x2a   : > { %4962 = vmatpush3.bf16.msra.mxu1 %v4951_v32  ;;  %4964 = vmatprep.subr.bf16.mxu0 %v5474_v18 }
  0x2b   : > { %4442 = vmatmul.mubr.msk.f32.gmra.mrb[12].mxu0 %vm303_vm0, %v5575_v38  ;;  %4972 = vmatprep.subr.bf16.mxu1 %v5474_v18 }
  0x2c   : > { %4462 = vmatmul.mubr.msk.f32.gmra.mrb[12].mxu1 %vm303_vm0, %v3820_v39  ;;  %4444 = vmatprep.mubr.msk.f32.mxu0 %vm303_vm0, %v5579_v40 }
  0x2d   : > { %4464 = vmatprep.mubr.msk.f32.mxu1 %vm303_vm0, %v3821_v41 }
  0x2f   : > { %4445 = vmatmul.mubr.msk.f32.gmra.mrb[14].mxu0 %vm303_vm0, %v5590_v42 }
  0x30   : > { %4465 = vmatmul.mubr.msk.f32.gmra.mrb[14].mxu1 %vm303_vm0, %v3822_v43  ;;  %4475 = vmatprep.mubr.msk.f32.mxu0 %vm303_vm0, %v5427_v6 }
  0x31   : > { %4495 = vmatprep.mubr.msk.f32.mxu1 %vm303_vm0, %v5430_v7 }
  0x33   : > { %4476 = vmatmul.mubr.msk.f32.vlgmr.msra.gmra.mrb[16].mxu0 %vm303_vm0, %v5437_v8 }
  0x34   : > { %4496 = vmatmul.mubr.msk.f32.vlgmr.msra.gmra.mrb[16].mxu1 %vm303_vm0, %v5440_v9  ;;  %4966 = vmatpush3.bf16.msra.mxu0 %v5474_v18 }
  0x35   : > { %4478 = vmatprep.mubr.msk.f32.mxu0 %vm303_vm0, %v5443_v10  ;;  %4498 = vmatprep.mubr.msk.f32.mxu1 %vm303_vm0, %v5446_v11 }
  0x36   : > { %4968 = vmatprep.subr.bf16.mxu0 %v4951_v32  ;;  %4974 = vmatpush3.bf16.msra.mxu1 %v5474_v18 }
  0x37   : > { %4479 = vmatmul.mubr.msk.f32.gmra.mrb[18].mxu0 %vm303_vm0, %v5461_v14  ;;  %4976 = vmatprep.subr.bf16.mxu1 %v4951_v32 }
  0x38   : > { %4499 = vmatmul.mubr.msk.f32.gmra.mrb[18].mxu1 %vm303_vm0, %v5464_v15  ;;  %4481 = vmatprep.mubr.msk.f32.mxu0 %vm303_vm0, %v5469_v16 }
  0x39   : > { %4501 = vmatprep.mubr.msk.f32.mxu1 %vm303_vm0, %v5472_v17  ;;  %4970 = vmatpush3.bf16.msra.mxu0 %v4951_v32 }
  0x3a   : > { %4978 = vmatpush3.bf16.msra.mxu1 %v4951_v32  ;;  %4980 = vmatprep.subr.bf16.mxu0 %v5617_v46 }
  0x3b   : > { %4482 = vmatmul.mubr.msk.f32.gmra.mrb[20].mxu0 %vm303_vm0, %v5485_v19 }
  0x3c   : > { %4502 = vmatmul.mubr.msk.f32.gmra.mrb[20].mxu1 %vm303_vm0, %v5488_v20  ;;  %4484 = vmatprep.mubr.msk.f32.mxu0 %vm303_vm0, %v5491_v21 }
  0x3d   : > { %4504 = vmatprep.mubr.msk.f32.mxu1 %vm303_vm0, %v5494_v22 }
  0x3f   : > { %4485 = vmatmul.mubr.msk.f32.gmra.mrb[22].mxu0 %vm303_vm0, %v5506_v23 }
  0x40   : > { %4505 = vmatmul.mubr.msk.f32.gmra.mrb[22].mxu1 %vm303_vm0, %v5509_v24  ;;  %4515 = vmatprep.mubr.msk.f32.mxu0 %vm303_vm0, %v5512_v25 }
  0x41   : > { %4535 = vmatprep.mubr.msk.f32.mxu1 %vm303_vm0, %v5515_v26 }
  0x43   : > { %4516 = vmatmul.mubr.msk.f32.vlgmr.msra.gmra.mrb[24].mxu0 %vm303_vm0, %v5533_v29 }
  0x44   : > { %4536 = vmatmul.mubr.msk.f32.vlgmr.msra.gmra.mrb[24].mxu1 %vm303_vm0, %v5536_v30  ;;  %4982 = vmatpush3.bf16.msra.mxu0 %v5617_v46 }
  0x45   : > { %4518 = vmatprep.mubr.msk.f32.mxu0 %vm303_vm0, %v5539_v31  ;;  %4538 = vmatprep.mubr.msk.f32.mxu1 %vm303_vm0, %v5542_v33 }
  0x46   : > { %4984 = vmatprep.subr.bf16.mxu0 %v5650_v49 }
  0x47   : > { %4519 = vmatmul.mubr.msk.f32.gmra.mrb[26].mxu0 %vm303_vm0, %v5552_v34 }
  0x48   : > { %4539 = vmatmul.mubr.msk.f32.gmra.mrb[26].mxu1 %vm303_vm0, %v5555_v35  ;;  %4521 = vmatprep.mubr.msk.f32.mxu0 %vm303_vm0, %v5560_v36 }
  0x49   : > { %4541 = vmatprep.mubr.msk.f32.mxu1 %vm303_vm0, %v5563_v37  ;;  %4986 = vmatpush3.bf16.msra.mxu0 %v5650_v49 }
  0x4b   : > { %4522 = vmatmul.mubr.msk.f32.gmra.mrb[28].mxu0 %vm303_vm0, %v5575_v38 }
  0x4c   : > { %4542 = vmatmul.mubr.msk.f32.gmra.mrb[28].mxu1 %vm303_vm0, %v3820_v39  ;;  %4524 = vmatprep.mubr.msk.f32.mxu0 %vm303_vm0, %v5579_v40 }
  0x4d   : > { %4544 = vmatprep.mubr.msk.f32.mxu1 %vm303_vm0, %v3821_v41 }
  0x4f   : > { %4525 = vmatmul.mubr.msk.f32.gmra.mrb[30].mxu0 %vm303_vm0, %v5590_v42 }
  0x50   : > { %4545 = vmatmul.mubr.msk.f32.gmra.mrb[30].mxu1 %vm303_vm0, %v3822_v43  ;;  %4555 = vmatprep.mubr.msk.f32.mxu0 %vm303_vm0, %v5427_v6 }
  0x53   : > { %4556 = vmatmul.mubr.msk.f32.vlgmr.msra.gmra.mrb[32].mxu0 %vm303_vm0, %v5437_v8 }
  0x54   : > { %4558 = vmatprep.mubr.msk.f32.mxu0 %vm303_vm0, %v5443_v10 }
  0x57   : > { %4559 = vmatmul.mubr.msk.f32.gmra.mrb[34].mxu0 %vm303_vm0, %v5461_v14 }
  0x58   : > { %4561 = vmatprep.mubr.msk.f32.mxu0 %vm303_vm0, %v5469_v16 }
  0x5b   : > { %4562 = vmatmul.mubr.msk.f32.gmra.mrb[36].mxu0 %vm303_vm0, %v5485_v19 }
  0x5c   : > { %4564 = vmatprep.mubr.msk.f32.mxu0 %vm303_vm0, %v5491_v21 }
  0x5f   : > { %4565 = vmatmul.mubr.msk.f32.gmra.mrb[38].mxu0 %vm303_vm0, %v5506_v23 }
  0xe6   : > { %v4397_v50 = vpop.f32.mrb[0].mxu0 }
  0xe7   : > { %v4417_v51 = vpop.f32.mrb[0].mxu1  ;;  %v394_v53 = vpop.f32.mrb[1].mxu0 }
  0xe8   : > { %v563_v52 = vmax.f32 %v4397_v50, %v4417_v51  ;;  %v523_v54 = vpop.f32.mrb[1].mxu1 }
  0xe9   : > { %v562_v55 = vmax.f32 %v394_v53, %v523_v54 }
  0xea   : > { %v4400_v56 = vpop.f32.mrb[2].mxu0 }
  0xeb   : > { %v4420_v57 = vpop.f32.mrb[2].mxu1  ;;  %v404_v59 = vpop.f32.mrb[3].mxu0 }
  0xec   : > { %v565_v58 = vmax.f32 %v4400_v56, %v4420_v57  ;;  %v533_v60 = vpop.f32.mrb[3].mxu1 }
  0xed   : > { %v564_v61 = vmax.f32 %v404_v59, %v533_v60 }
  0xee   : > { %v4403_v62 = vpop.f32.mrb[4].mxu0 }
  0xef   : > { %v4423_v63 = vpop.f32.mrb[4].mxu1  ;;  %v414_v1 = vpop.f32.mrb[5].mxu0 }
  0xf0   : > { %v567_v0 = vmax.f32 %v4403_v62, %v4423_v63  ;;  %v543_v2 = vpop.f32.mrb[5].mxu1 }
  0xf1   : > { %v566_v3 = vmax.f32 %v414_v1, %v543_v2 }
  0xf2   : > { %v4406_v4 = vpop.f32.mrb[6].mxu0 }
  0xf3   : > { %v4426_v5 = vpop.f32.mrb[6].mxu1  ;;  %v424_v10 = vpop.f32.mrb[7].mxu0 }
  0xf4   : > { %v569_v6 = vmax.f32 %v4406_v4, %v4426_v5  ;;  %v553_v12 = vpop.f32.mrb[7].mxu1 }
  0xf5   : > { %v568_v13 = vmax.f32 %v424_v10, %v553_v12 }
  0xf6   : > { %v4437_v16 = vpop.f32.mrb[8].mxu0 }
  0xf7   : > { %v4457_v18 = vpop.f32.mrb[8].mxu1  ;;  %v660_v27 = vpop.f32.mrb[9].mxu0 }
  0xf8   : > { %v829_v26 = vmax.f32 %v4437_v16, %v4457_v18  ;;  %v789_v28 = vpop.f32.mrb[9].mxu1 }
  0xf9   : > { %v828_v30 = vmax.f32 %v660_v27, %v789_v28 }
  0xfa   : > { %v837_v32 = vmax.f32 %v563_v52, %v829_v26  ;;  %v4440_v35 = vpop.f32.mrb[10].mxu0 }
  0xfb   : > { %v836_v33 = vmax.f32 %v562_v55, %v828_v30  ;;  %v4460_v37 = vpop.f32.mrb[10].mxu1  ;;  %v670_v41 = vpop.f32.mrb[11].mxu0 }
  0xfc   : > { %v831_v39 = vmax.f32 %v4440_v35, %v4460_v37  ;;  %v799_v43 = vpop.f32.mrb[11].mxu1 }
  0xfd   : > { %v5702_v45 = vpack.c.bf16 %v837_v32, %v836_v33  ;;  %v830_v47 = vmax.f32 %v670_v41, %v799_v43 }
  0xfe   : > { %v839_v48 = vmax.f32 %v565_v58, %v831_v39  ;;  %v4443_v51 = vpop.f32.mrb[12].mxu0 }
  0xff   : > { %v838_v50 = vmax.f32 %v564_v61, %v830_v47  ;;  %v4463_v53 = vpop.f32.mrb[12].mxu1  ;;  %4989 = vmatprep.subr.msk.bf16.mxu1 %vm5698_vm2, %v5702_v45  ;;  %v680_v54 = vpop.f32.mrb[13].mxu0 }
 0x100   : > { %v833_v52 = vmax.f32 %v4443_v51, %v4463_v53  ;;  %v809_v55 = vpop.f32.mrb[13].mxu1  ;;  %4992 = vmatpush3.bf16.xpose.msk.msra.mxu1 %vm5698_vm2, %v5702_v45 }
 0x101   : > { %v5710_v56 = vpack.c.bf16 %v839_v48, %v838_v50  ;;  %v832_v57 = vmax.f32 %v680_v54, %v809_v55 }
 0x102   : > { %v841_v59 = vmax.f32 %v567_v0, %v833_v52  ;;  %v4446_v58 = vpop.f32.mrb[14].mxu0 }
 0x103   : > { %v840_v60 = vmax.f32 %v566_v3, %v832_v57  ;;  %v4466_v61 = vpop.f32.mrb[14].mxu1  ;;  %4995 = vmatprep.subr.msk.bf16.mxu1 %vm5698_vm2, %v5710_v56  ;;  %v690_v63 = vpop.f32.mrb[15].mxu0 }
 0x104   : > { %v835_v62 = vmax.f32 %v4446_v58, %v4466_v61  ;;  %v819_v1 = vpop.f32.mrb[15].mxu1 }
 0x105   : > { %v5715_v2 = vpack.c.bf16 %v841_v59, %v840_v60  ;;  %v834_v4 = vmax.f32 %v690_v63, %v819_v1 }
 0x106   : > { %v843_v5 = vmax.f32 %v569_v6, %v835_v62  ;;  %v4477_v12 = vpop.f32.mrb[16].mxu0 }
 0x107   : > { %v842_v10 = vmax.f32 %v568_v13, %v834_v4  ;;  %v4497_v16 = vpop.f32.mrb[16].mxu1  ;;  %v910_v26 = vpop.f32.mrb[17].mxu0 }
 0x108   : > { %v1055_v18 = vmax.f32 %v4477_v12, %v4497_v16  ;;  %v1015_v0 = vpop.f32.mrb[17].mxu1  ;;  %4998 = vmatpush3.bf16.xpose.msk.msra.mxu1 %vm5698_vm2, %v5710_v56 }
 0x109   : > { %v5720_v3 = vpack.c.bf16 %v843_v5, %v842_v10  ;;  %v1054_v27 = vmax.f32 %v910_v26, %v1015_v0  ;;  %5001 = vmatprep.subr.msk.bf16.mxu1 %vm5698_vm2, %v5715_v2 }
 0x10a   : > { %v4480_v28 = vpop.f32.mrb[18].mxu0 }
 0x10b   : > { %v4500_v30 = vpop.f32.mrb[18].mxu1  ;;  %v920_v13 = vpop.f32.mrb[19].mxu0 }
 0x10c   : > { %v1057_v6 = vmax.f32 %v4480_v28, %v4500_v30  ;;  %v1025_v32 = vpop.f32.mrb[19].mxu1 }
 0x10d   : > { %v1056_v33 = vmax.f32 %v920_v13, %v1025_v32 }
 0x10e   : > { %v4483_v35 = vpop.f32.mrb[20].mxu0 }
 0x10f   : > { %v4503_v37 = vpop.f32.mrb[20].mxu1  ;;  %v930_v41 = vpop.f32.mrb[21].mxu0 }
 0x110   : > { %v1059_v39 = vmax.f32 %v4483_v35, %v4503_v37  ;;  %v1035_v43 = vpop.f32.mrb[21].mxu1  ;;  %5004 = vmatpush3.bf16.xpose.msk.msra.mxu1 %vm5698_vm2, %v5715_v2 }
 0x111   : > { %v1058_v47 = vmax.f32 %v930_v41, %v1035_v43  ;;  %5007 = vmatprep.subr.msk.bf16.mxu1 %vm5698_vm2, %v5720_v3 }
 0x112   : > { %v4486_v48 = vpop.f32.mrb[22].mxu0 }
 0x113   : > { %v4506_v50 = vpop.f32.mrb[22].mxu1  ;;  %v940_v53 = vpop.f32.mrb[23].mxu0 }
 0x114   : > { %v1061_v51 = vmax.f32 %v4486_v48, %v4506_v50  ;;  %v1045_v52 = vpop.f32.mrb[23].mxu1 }
 0x115   : > { %v1060_v54 = vmax.f32 %v940_v53, %v1045_v52 }
 0x116   : > { %v4517_v55 = vpop.f32.mrb[24].mxu0 }
 0x117   : > { %v4537_v57 = vpop.f32.mrb[24].mxu1  ;;  %v1128_v60 = vpop.f32.mrb[25].mxu0 }
 0x118   : > { %v1273_v59 = vmax.f32 %v4517_v55, %v4537_v57  ;;  %v1233_v58 = vpop.f32.mrb[25].mxu1  ;;  %5010 = vmatpush3.bf16.xpose.msk.msra.mxu1 %vm5698_vm2, %v5720_v3 }
 0x119   : > { %v1272_v61 = vmax.f32 %v1128_v60, %v1233_v58  ;;  %5032 = vmatprep.subr.bf16.mxu1 %v5617_v46 }
 0x11a   : > { %v1281_v62 = vmax.f32 %v1055_v18, %v1273_v59  ;;  %v4520_v1 = vpop.f32.mrb[26].mxu0 }
 0x11b   : > { %v1280_v63 = vmax.f32 %v1054_v27, %v1272_v61  ;;  %v4540_v4 = vpop.f32.mrb[26].mxu1  ;;  %v1138_v10 = vpop.f32.mrb[27].mxu0 }
 0x11c   : > { %v1275_v5 = vmax.f32 %v4520_v1, %v4540_v4  ;;  %v1243_v12 = vpop.f32.mrb[27].mxu1 }
 0x11d   : > { %v5735_v16 = vpack.c.bf16 %v1281_v62, %v1280_v63  ;;  %v1274_v26 = vmax.f32 %v1138_v10, %v1243_v12 }
 0x11e   : > { %v1283_v0 = vmax.f32 %v1057_v6, %v1275_v5  ;;  %v4523_v30 = vpop.f32.mrb[28].mxu0 }
 0x11f   : > { %v1282_v28 = vmax.f32 %v1056_v33, %v1274_v26  ;;  %v4543_v13 = vpop.f32.mrb[28].mxu1  ;;  %5012 = vmatprep.subr.bf16.mxu0 %v5735_v16  ;;  %v1148_v35 = vpop.f32.mrb[29].mxu0 }
 0x120   : > { %v1277_v32 = vmax.f32 %v4523_v30, %v4543_v13  ;;  %v1253_v37 = vpop.f32.mrb[29].mxu1  ;;  %5014 = vmatpush3.bf16.msra.mxu0 %v5735_v16 }
 0x121   : > { %v5739_v18 = vpack.c.bf16 %v1283_v0, %v1282_v28  ;;  %v1276_v27 = vmax.f32 %v1148_v35, %v1253_v37 }
 0x122   : > { %v1285_v41 = vmax.f32 %v1059_v39, %v1277_v32  ;;  %v4526_v48 = vpop.f32.mrb[30].mxu0 }
 0x123   : > { %v1284_v43 = vmax.f32 %v1058_v47, %v1276_v27  ;;  %v4546_v50 = vpop.f32.mrb[30].mxu1  ;;  %5016 = vmatprep.subr.bf16.mxu0 %v5739_v18  ;;  %v1158_v33 = vpop.f32.mrb[31].mxu0 }
 0x124   : > { %v1279_v6 = vmax.f32 %v4526_v48, %v4546_v50  ;;  %v1263_v53 = vpop.f32.mrb[31].mxu1  ;;  %5018 = vmatpush3.bf16.msra.mxu0 %v5739_v18 }
 0x125   : > { %v5743_v52 = vpack.c.bf16 %v1285_v41, %v1284_v43  ;;  %v1278_v55 = vmax.f32 %v1158_v33, %v1263_v53 }
 0x126   : > { %v1287_v57 = vmax.f32 %v1061_v51, %v1279_v6  ;;  %v4557_v60 = vpop.f32.mrb[32].mxu0 }
 0x127   : > { %v1286_v59 = vmax.f32 %v1060_v54, %v1278_v55  ;;  %5020 = vmatprep.subr.bf16.mxu0 %v5743_v52  ;;  %v1354_v58 = vpop.f32.mrb[33].mxu0 }
 0x128   : > { %5022 = vmatpush3.bf16.msra.mxu0 %v5743_v52  ;;  %4583 = vmatprep.mubr.msk.f32.mxu1 %vm1393_vm1, %v1354_v58 }
 0x129   : > { %v5747_v39 = vpack.c.bf16 %v1287_v57, %v1286_v59  ;;  %4584 = vmatmul.mubr.msk.f32.vlgmr.msra.gmra.mrb[32].mxu1 %vm1393_vm1, %v4557_v60 }
 0x12a   : > { %5034 = vmatpush3.bf16.msra.mxu1 %v5617_v46  ;;  %v4560_v47 = vpop.f32.mrb[34].mxu0 }
 0x12b   : > { %5024 = vmatprep.subr.bf16.mxu0 %v5747_v39  ;;  %v1364_v61 = vpop.f32.mrb[35].mxu0  ;;  %5036 = vmatprep.subr.bf16.mxu1 %v5650_v49 }
 0x12c   : > { %5026 = vmatpush3.bf16.msra.mxu0 %v5747_v39  ;;  %4586 = vmatprep.mubr.msk.f32.mxu1 %vm1393_vm1, %v1364_v61 }
 0x12d   : > { %4587 = vmatmul.mubr.msk.f32.gmra.mrb[34].mxu1 %vm1393_vm1, %v4560_v47 }
 0x12e   : > { %5038 = vmatpush3.bf16.msra.mxu1 %v5650_v49  ;;  %v4563_v51 = vpop.f32.mrb[36].mxu0 }
 0x12f   : > { %5064 = vmatprep.subr.bf16.mxu1 %v5735_v16  ;;  %v1374_v54 = vpop.f32.mrb[37].mxu0 }
 0x130   : > { %4589 = vmatprep.mubr.msk.f32.mxu1 %vm1393_vm1, %v1374_v54 }
 0x131   : > { %4590 = vmatmul.mubr.msk.f32.gmra.mrb[36].mxu1 %vm1393_vm1, %v4563_v51 }
 0x132   : > { %v4566_v62 = vpop.f32.mrb[38].mxu0 }
 0x133   : > { %v1384_v63 = vpop.f32.mrb[39].mxu0 }
 0x134   : > { %4592 = vmatprep.mubr.msk.f32.mxu1 %vm1393_vm1, %v1384_v63 }
 0x135   : > { %4593 = vmatmul.mubr.msk.f32.gmra.mrb[38].mxu1 %vm1393_vm1, %v4566_v62 }
 0x136   : > { %4647 = vmatprep.mubr.msk.f32.mxu1 %vm303_vm0, %v5430_v7 }
 0x139   : > { %4648 = vmatmul.mubr.msk.f32.vlgmr.msra.gmra.mrb[40].mxu1 %vm303_vm0, %v5440_v9 }
 0x13a   : > { %5066 = vmatpush3.bf16.msra.mxu1 %v5735_v16  ;;  %4650 = vmatprep.mubr.msk.f32.mxu1 %vm303_vm0, %v5446_v11 }
 0x13b   : > { %5068 = vmatprep.subr.bf16.mxu1 %v5739_v18 }
 0x13d   : > { %4651 = vmatmul.mubr.msk.f32.gmra.mrb[42].mxu1 %vm303_vm0, %v5464_v15 }
 0x13e   : > { %5070 = vmatpush3.bf16.msra.mxu1 %v5739_v18  ;;  %4653 = vmatprep.mubr.msk.f32.mxu1 %vm303_vm0, %v5472_v17 }
 0x13f   : > { %5072 = vmatprep.subr.bf16.mxu1 %v5743_v52 }
 0x141   : > { %4654 = vmatmul.mubr.msk.f32.gmra.mrb[44].mxu1 %vm303_vm0, %v5488_v20 }
 0x142   : > { %5074 = vmatpush3.bf16.msra.mxu1 %v5743_v52  ;;  %4656 = vmatprep.mubr.msk.f32.mxu1 %vm303_vm0, %v5494_v22 }
 0x143   : > { %5076 = vmatprep.subr.bf16.mxu1 %v5747_v39 }
 0x145   : > { %4657 = vmatmul.mubr.msk.f32.gmra.mrb[46].mxu1 %vm303_vm0, %v5509_v24 }
 0x146   : > { %5078 = vmatpush3.bf16.msra.mxu1 %v5747_v39 }
 0x1fc   : > { %v4585_v7 = vpop.f32.mrb[32].mxu1 }
 0x1fd   : > { %v1508_v9 = vpop.f32.mrb[33].mxu1  ;;  %v1551_v20 = vsel %vm1547_vm3, %v4585_v7, -inf }
 0x1fe   : > { %v1548_v11 = vsel %vm1547_vm3, %v1508_v9, -inf }
 0x1ff   : > { %1549 = vmax.xlane.f32.xlu0 %v1548_v11 }
 0x200   : > { %v4588_v15 = vpop.f32.mrb[34].mxu1 }
 0x201   : > { %v1518_v17 = vpop.f32.mrb[35].mxu1  ;;  %v1557_v4 = vsel %vm1547_vm3, %v4588_v15, -inf }
 0x202   : > { %v1554_v1 = vsel %vm1547_vm3, %v1518_v17, -inf }
 0x203   : > { %1552 = vmax.xlane.f32.xlu0 %v1551_v20  ;;  %1555 = vmax.xlane.f32.xlu1 %v1554_v1 }
 0x204   : > { %v4591_v22 = vpop.f32.mrb[36].mxu1 }
 0x205   : > { %v1528_v24 = vpop.f32.mrb[37].mxu1  ;;  %v1563_v12 = vsel %vm1547_vm3, %v4591_v22, -inf }
 0x206   : > { %v1560_v5 = vsel %vm1547_vm3, %v1528_v24, -inf }
 0x207   : > { %1558 = vmax.xlane.f32.xlu1 %v1557_v4  ;;  %1561 = vmax.xlane.f32.xlu0 %v1560_v5 }
 0x208   : > { %v4594_v10 = vpop.f32.mrb[38].mxu1 }
 0x209   : > { %v1538_v26 = vpop.f32.mrb[39].mxu1  ;;  %v1569_v28 = vsel %vm1547_vm3, %v4594_v10, -inf }
 0x20a   : > { %v1566_v0 = vsel %vm1547_vm3, %v1538_v26, -inf }
 0x20b   : > { %1564 = vmax.xlane.f32.xlu1 %v1563_v12  ;;  %1567 = vmax.xlane.f32.xlu0 %v1566_v0 }
 0x20f   : > { %1570 = vmax.xlane.f32.xlu1 %v1569_v28 }
 0x28c   : > { %v1550_v30 = vpop.xlane.xlu0 %1549 }
 0x28d   : > { %v1572_v13 = vsub.f32 %v1508_v9, %v1550_v30  ;;  %v266_v30 = vld [vmem:[%s6251_s5] sm:$0xff] }
 0x28f   : > { %v1580_v32 = vmul.f32 1.442695, %v1572_v13  ;;  %v267_v13 = vld [vmem:[%s6251_s5 + $0x8] sm:$0xff] }
 0x290   : > { %v1553_v35 = vpop.xlane.xlu0 %1552  ;;  %v1556_v37 = vpop.xlane.xlu1 %1555 }
 0x291   : > { %5195 = vpow2.f32 %v1580_v32  ;;  %v1573_v27 = vsub.f32 %v4585_v7, %v1553_v35  ;;  %v1574_v41 = vsub.f32 %v1518_v17, %v1556_v37  ;;  %v5808_v32 = vpack.c.bf16 %v267_v13, %v266_v30 }
 0x293   : > { %v1582_v43 = vmul.f32 1.442695, %v1573_v27  ;;  %v1584_v48 = vmul.f32 1.442695, %v1574_v41  ;;  %5028 = vmatprep.subr.bf16.mxu0 %v5808_v32  ;;  %5080 = vmatprep.subr.bf16.mxu1 %v5808_v32 }
 0x294   : > { %v1559_v50 = vpop.xlane.xlu1 %1558  ;;  %v1562_v6 = vpop.xlane.xlu0 %1561 }
 0x295   : > { %5197 = vpow2.f32 %v1582_v43  ;;  %v1575_v33 = vsub.f32 %v4588_v15, %v1559_v50  ;;  %v1576_v53 = vsub.f32 %v1528_v24, %v1562_v6 }
 0x296   : > { %5199 = vpow2.f32 %v1584_v48 }
 0x297   : > { %v1586_v55 = vmul.f32 1.442695, %v1575_v33  ;;  %v1588_v57 = vmul.f32 1.442695, %v1576_v53 }
 0x298   : > { %v1565_v59 = vpop.xlane.xlu1 %1564  ;;  %v1568_v60 = vpop.xlane.xlu0 %1567 }
 0x299   : > { %5201 = vpow2.f32 %v1586_v55  ;;  %v1577_v58 = vsub.f32 %v4591_v22, %v1565_v59  ;;  %v1578_v47 = vsub.f32 %v1538_v26, %v1568_v60 }
 0x29a   : > { %5203 = vpow2.f32 %v1588_v57 }
 0x29b   : > { %v5196_v61 = vpop.eup %5195  ;;  %v1590_v51 = vmul.f32 1.442695, %v1577_v58  ;;  %v1592_v54 = vmul.f32 1.442695, %v1578_v47 }
 0x29c   : > { %v1571_v62 = vpop.xlane.xlu1 %1570  ;;  %v1596_v63 = vsel %vm1547_vm3, %v5196_v61, 0.0 }
 0x29d   : > { %5205 = vpow2.f32 %v1590_v51  ;;  %v1579_v7 = vsub.f32 %v4594_v10, %v1571_v62  ;;  %1597 = vadd.xlane.f32.xlu0 %v1596_v63 }
 0x29e   : > { %5207 = vpow2.f32 %v1592_v54 }
 0x29f   : > { %v5198_v9 = vpop.eup %5197  ;;  %v1594_v11 = vmul.f32 1.442695, %v1579_v7 }
 0x2a0   : > { %v5200_v15 = vpop.eup %5199  ;;  %v1599_v17 = vsel %vm1547_vm3, %v5198_v9, 0.0 }
 0x2a1   : > { %5209 = vpow2.f32 %v1594_v11  ;;  %1600 = vadd.xlane.f32.xlu1 %v1599_v17  ;;  %v1602_v20 = vsel %vm1547_vm3, %v5200_v15, 0.0 }
 0x2a2   : > { %1603 = vadd.xlane.f32.xlu0 %v1602_v20 }
 0x2a3   : > { %v5202_v1 = vpop.eup %5201 }
 0x2a4   : > { %v5204_v22 = vpop.eup %5203  ;;  %v1605_v4 = vsel %vm1547_vm3, %v5202_v1, 0.0 }
 0x2a5   : > { %1606 = vadd.xlane.f32.xlu1 %v1605_v4  ;;  %v1608_v24 = vsel %vm1547_vm3, %v5204_v22, 0.0 }
 0x2a6   : > { %1609 = vadd.xlane.f32.xlu0 %v1608_v24 }
 0x2a7   : > { %v5206_v5 = vpop.eup %5205 }
 0x2a8   : > { %v5208_v10 = vpop.eup %5207  ;;  %v1611_v12 = vsel %vm1547_vm3, %v5206_v5, 0.0 }
 0x2a9   : > { %1612 = vadd.xlane.f32.xlu1 %v1611_v12  ;;  %v1614_v26 = vsel %vm1547_vm3, %v5208_v10, 0.0 }
 0x2aa   : > { %1615 = vadd.xlane.f32.xlu0 %v1614_v26 }
 0x2ab   : > { %v5210_v0 = vpop.eup %5209 }
 0x2ac   : > { %v1617_v28 = vsel %vm1547_vm3, %v5210_v0, 0.0 }
 0x2ad   : > { %1618 = vadd.xlane.f32.xlu1 %v1617_v28 }
 0x32a   : > { %v1598_v35 = vpop.xlane.xlu0 %1597 }
 0x32b   : > { %5211 = vrcp.f32 %v1598_v35 }
 0x32e   : > { %v1601_v37 = vpop.xlane.xlu1 %1600 }
 0x32f   : > { %5213 = vrcp.f32 %v1601_v37  ;;  %v1604_v27 = vpop.xlane.xlu0 %1603 }
 0x330   : > { %5215 = vrcp.f32 %v1604_v27 }
 0x332   : > { %v1607_v41 = vpop.xlane.xlu1 %1606 }
 0x333   : > { %5217 = vrcp.f32 %v1607_v41  ;;  %v1610_v43 = vpop.xlane.xlu0 %1609 }
 0x334   : > { %5219 = vrcp.f32 %v1610_v43 }
 0x335   : > { %v5212_v48 = vpop.eup %5211 }
 0x336   : > { %v1613_v50 = vpop.xlane.xlu1 %1612  ;;  %v1621_v6 = vmul.f32 %v5212_v48, %v5196_v61 }
 0x337   : > { %5221 = vrcp.f32 %v1613_v50  ;;  %v1616_v33 = vpop.xlane.xlu0 %1615  ;;  %v5324_v50 = vld [vmem:[%s5424_s11 + $0x10] sm:$0xff] }
 0x338   : > { %5223 = vrcp.f32 %v1616_v33  ;;  %4611 = vmatprep.mubr.msk.f32.mxu0 %vm1547_vm3, %v1621_v6 }
 0x339   : > { %v5214_v53 = vpop.eup %5213 }
 0x33a   : > { %v5216_v55 = vpop.eup %5215  ;;  %v1623_v57 = vmul.f32 %v5214_v53, %v5198_v9  ;;  %v1619_v59 = vpop.xlane.xlu1 %1618 }
 0x33b   : > { %5225 = vrcp.f32 %v1619_v59  ;;  %v1625_v60 = vmul.f32 %v5216_v55, %v5200_v15  ;;  %v4649_v15 = vpop.f32.mrb[40].mxu1  ;;  %v5325_v59 = vld [vmem:[%s5424_s11 + $0x20] sm:$0xff] }
 0x33c   : > { %4612 = vmatmul.mubr.msk.f32.vlgmr.msra.gmra.mrb[40].mxu0 %vm1547_vm3, %v1623_v57  ;;  %v1986_v17 = vpop.f32.mrb[41].mxu1 }
 0x33d   : > { %v5218_v58 = vpop.eup %5217  ;;  %5030 = vmatpush3.bf16.msra.mxu0 %v5808_v32  ;;  %4614 = vmatprep.mubr.msk.f32.mxu0 %vm1547_vm3, %v1625_v60  ;;  %v4652_v20 = vpop.f32.mrb[42].mxu1 }
 0x33e   : > { %v5220_v47 = vpop.eup %5219  ;;  %5041 = vmatprep.subr.msk.bf16.mxu0 %vm5698_vm2, %v5702_v45  ;;  %v1627_v61 = vmul.f32 %v5218_v58, %v5202_v1  ;;  %v1996_v1 = vpop.f32.mrb[43].mxu1 }
 0x33f   : > { %v1629_v51 = vmul.f32 %v5220_v47, %v5204_v22  ;;  %v4655_v22 = vpop.f32.mrb[44].mxu1 }
 0x340   : > { %4615 = vmatmul.mubr.msk.f32.gmra.mrb[42].mxu0 %vm1547_vm3, %v1627_v61  ;;  %v2006_v4 = vpop.f32.mrb[45].mxu1 }
 0x341   : > { %v5222_v54 = vpop.eup %5221  ;;  %4617 = vmatprep.mubr.msk.f32.mxu0 %vm1547_vm3, %v1629_v51  ;;  %v4658_v24 = vpop.f32.mrb[46].mxu1 }
 0x342   : > { %v5224_v62 = vpop.eup %5223  ;;  %v1631_v63 = vmul.f32 %v5222_v54, %v5206_v5  ;;  %v2016_v12 = vpop.f32.mrb[47].mxu1 }
 0x343   : > { %v1633_v7 = vmul.f32 %v5224_v62, %v5208_v10 }
 0x344   : > { %4618 = vmatmul.mubr.msk.f32.gmra.mrb[44].mxu0 %vm1547_vm3, %v1631_v63 }
 0x345   : > { %v5226_v9 = vpop.eup %5225  ;;  %4620 = vmatprep.mubr.msk.f32.mxu0 %vm1547_vm3, %v1633_v7 }
 0x346   : > { %v1635_v11 = vmul.f32 %v5226_v9, %v5210_v0 }
 0x348   : > { %4621 = vmatmul.mubr.msk.f32.gmra.mrb[46].mxu0 %vm1547_vm3, %v1635_v11 }
 0x40f   : > { %v4613_v26 = vpop.f32.mrb[40].mxu0 }
 0x410   : > { %v1726_v5 = vpop.f32.mrb[41].mxu0 }
 0x411   : > { %4627 = vmatprep.mubr.msk.f32.mxu0 %vm1765_vm4, %v1726_v5 }
 0x412   : > { %4628 = vmatmul.mubr.msk.f32.vlgmr.msra.gmra.mrb[48].mxu0 %vm1765_vm4, %v4613_v26 }
 0x413   : > { %5044 = vmatpush3.bf16.xpose.msk.msra.mxu0 %vm5698_vm2, %v5702_v45  ;;  %v4616_v10 = vpop.f32.mrb[42].mxu0 }
 0x414   : > { %5047 = vmatprep.subr.msk.bf16.mxu0 %vm5698_vm2, %v5710_v56  ;;  %v1736_v0 = vpop.f32.mrb[43].mxu0 }
 0x415   : > { %4630 = vmatprep.mubr.msk.f32.mxu0 %vm1765_vm4, %v1736_v0 }
 0x416   : > { %4631 = vmatmul.mubr.msk.f32.gmra.mrb[50].mxu0 %vm1765_vm4, %v4616_v10 }
 0x417   : > { %v4619_v28 = vpop.f32.mrb[44].mxu0 }
 0x418   : > { %v1746_v30 = vpop.f32.mrb[45].mxu0 }
 0x419   : > { %4633 = vmatprep.mubr.msk.f32.mxu0 %vm1765_vm4, %v1746_v30 }
 0x41a   : > { %4634 = vmatmul.mubr.msk.f32.gmra.mrb[52].mxu0 %vm1765_vm4, %v4619_v28 }
 0x41b   : > { %5050 = vmatpush3.bf16.xpose.msk.msra.mxu0 %vm5698_vm2, %v5710_v56  ;;  %v4622_v13 = vpop.f32.mrb[46].mxu0 }
 0x41c   : > { %5053 = vmatprep.subr.msk.bf16.mxu0 %vm5698_vm2, %v5715_v2  ;;  %v1756_v35 = vpop.f32.mrb[47].mxu0 }
 0x41d   : > { %4636 = vmatprep.mubr.msk.f32.mxu0 %vm1765_vm4, %v1756_v35 }
 0x41e   : > { %4637 = vmatmul.mubr.msk.f32.gmra.mrb[54].mxu0 %vm1765_vm4, %v4622_v13 }
 0x41f   : > { %4675 = vmatprep.mubr.msk.f32.mxu0 %vm1393_vm1, %v1986_v17 }
 0x423   : > { %5056 = vmatpush3.bf16.xpose.msk.msra.mxu0 %vm5698_vm2, %v5715_v2 }
 0x424   : > { %5059 = vmatprep.subr.msk.bf16.mxu0 %vm5698_vm2, %v5720_v3 }
 0x42b   : > { %5062 = vmatpush3.bf16.xpose.msk.msra.mxu0 %vm5698_vm2, %v5720_v3 }
 0x42c   : > { %5084 = vmatprep.subr.bf16.mxu0 %v5617_v46 }
 0x432   : > { %4676 = vmatmul.mubr.msk.f32.vlgmr.msra.gmra.mrb[56].mxu0 %vm1393_vm1, %v4649_v15 }
 0x433   : > { %5086 = vmatpush3.bf16.msra.mxu0 %v5617_v46  ;;  %4678 = vmatprep.mubr.msk.f32.mxu0 %vm1393_vm1, %v1996_v1 }
 0x434   : > { %5088 = vmatprep.subr.bf16.mxu0 %v5650_v49 }
 0x436   : > { %4679 = vmatmul.mubr.msk.f32.gmra.mrb[58].mxu0 %vm1393_vm1, %v4652_v20 }
 0x437   : > { %5090 = vmatpush3.bf16.msra.mxu0 %v5650_v49  ;;  %4681 = vmatprep.mubr.msk.f32.mxu0 %vm1393_vm1, %v2006_v4 }
 0x438   : > { %5116 = vmatprep.subr.bf16.mxu0 %v5735_v16 }
 0x43a   : > { %4682 = vmatmul.mubr.msk.f32.gmra.mrb[60].mxu0 %vm1393_vm1, %v4655_v22 }
 0x43b   : > { %4684 = vmatprep.mubr.msk.f32.mxu0 %vm1393_vm1, %v2016_v12 }
 0x43e   : > { %4685 = vmatmul.mubr.msk.f32.gmra.mrb[62].mxu0 %vm1393_vm1, %v4658_v24 }
 0x43f   : > { %4739 = vmatprep.mubr.msk.f32.mxu0 %vm303_vm0, %v5512_v25  ;;  %v5890_v25 = vstv %s253_s10 }
 0x442   : > { %4740 = vmatmul.mubr.msk.f32.vlgmr.msra.gmra.mrb[64].mxu0 %vm303_vm0, %v5533_v29 }
 0x443   : > { %5118 = vmatpush3.bf16.msra.mxu0 %v5735_v16  ;;  %4742 = vmatprep.mubr.msk.f32.mxu0 %vm303_vm0, %v5539_v31 }
 0x444   : > { %5120 = vmatprep.subr.bf16.mxu0 %v5739_v18 }
 0x446   : > { %4743 = vmatmul.mubr.msk.f32.gmra.mrb[66].mxu0 %vm303_vm0, %v5552_v34 }
 0x447   : > { %5122 = vmatpush3.bf16.msra.mxu0 %v5739_v18  ;;  %4745 = vmatprep.mubr.msk.f32.mxu0 %vm303_vm0, %v5560_v36 }
 0x448   : > { %5124 = vmatprep.subr.bf16.mxu0 %v5743_v52 }
 0x44a   : > { %4746 = vmatmul.mubr.msk.f32.gmra.mrb[68].mxu0 %vm303_vm0, %v5575_v38 }
 0x44b   : > { %5126 = vmatpush3.bf16.msra.mxu0 %v5743_v52  ;;  %4748 = vmatprep.mubr.msk.f32.mxu0 %vm303_vm0, %v5579_v40  ;;  %v5323_v40 = vld [vmem:[%s5424_s11] sm:$0xff] }
 0x44c   : > { %5128 = vmatprep.subr.bf16.mxu0 %v5747_v39 }
 0x44e   : > { %4749 = vmatmul.mubr.msk.f32.gmra.mrb[70].mxu0 %vm303_vm0, %v5590_v42 }
 0x44f   : > { %5130 = vmatpush3.bf16.msra.mxu0 %v5747_v39 }
 0x450   : > { %5132 = vmatprep.subr.bf16.mxu0 %v5808_v32 }
 0x4e5   : > { %v4629_v29 = vpop.f32.mrb[48].mxu0 }
 0x4e6   : > { %v1897_v31 = vmul.f32 %v4629_v29, %v5890_v25  ;;  %v1856_v34 = vpop.f32.mrb[49].mxu0 }
 0x4e7   : > { %v1896_v36 = vmul.f32 %v5890_v25, %v1856_v34 }
 0x4e8   : > { %v1905_v38 = vadd.f32 %v1897_v31, %v5437_v8 }
 0x4e9   : > { %v1904_v42 = vadd.f32 %v5323_v40, %v1896_v36  ;;  %v4632_v37 = vpop.f32.mrb[50].mxu0 }
 0x4ea   : > { %1913 = vst.msk [vmem:[%s5898_s14 + $0x8] sm:$0xff] %vm303_vm0, %v1905_v38  ;;  %v1899_v27 = vmul.f32 %v4632_v37, %v5890_v25  ;;  %v1866_v41 = vpop.f32.mrb[51].mxu0 }
 0x4eb   : > { %1912 = vst.msk [vmem:[%s5898_s14] sm:$0xff] %vm303_vm0, %v1904_v42  ;;  %v1898_v43 = vmul.f32 %v5890_v25, %v1866_v41 }
 0x4ec   : > { %v1907_v48 = vadd.f32 %v1899_v27, %v5461_v14 }
 0x4ed   : > { %v1906_v8 = vadd.f32 %v5324_v50, %v1898_v43  ;;  %v4635_v6 = vpop.f32.mrb[52].mxu0 }
 0x4ee   : > { %1915 = vst.msk [vmem:[%s5898_s14 + $0x18] sm:$0xff] %vm303_vm0, %v1907_v48  ;;  %v1901_v33 = vmul.f32 %v4635_v6, %v5890_v25  ;;  %v1876_v53 = vpop.f32.mrb[53].mxu0 }
 0x4ef   : > { %1914 = vst.msk [vmem:[%s5898_s14 + $0x10] sm:$0xff] %vm303_vm0, %v1906_v8  ;;  %v1900_v55 = vmul.f32 %v5890_v25, %v1876_v53 }
 0x4f0   : > { %v1909_v57 = vadd.f32 %v1901_v33, %v5485_v19 }
 0x4f1   : > { %v1908_v60 = vadd.f32 %v5325_v59, %v1900_v55  ;;  %v4638_v14 = vpop.f32.mrb[54].mxu0 }
 0x4f2   : > { %1917 = vst.msk [vmem:[%s5898_s14 + $0x28] sm:$0xff] %vm303_vm0, %v1909_v57  ;;  %v1903_v58 = vmul.f32 %v4638_v14, %v5890_v25  ;;  %v1886_v47 = vpop.f32.mrb[55].mxu0 }
 0x4f3   : > { %1916 = vst.msk [vmem:[%s5898_s14 + $0x20] sm:$0xff] %vm303_vm0, %v1908_v60  ;;  %v1902_v61 = vmul.f32 %v5890_v25, %v1886_v47 }
 0x4f4   : > { %v1911_v51 = vadd.f32 %v1903_v58, %v5506_v23 }
 0x4f5   : > { %v1910_v54 = vadd.f32 %v1902_v61, %v5491_v21 }
 0x4f6   : > { %1919 = vst.msk [vmem:[%s5898_s14 + $0x38] sm:$0xff] %vm303_vm0, %v1911_v51 }
 0x4f7   : > { %1918 = vst.msk [vmem:[%s5898_s14 + $0x30] sm:$0xff] %vm303_vm0, %v1910_v54 }
 0x505   : > { %v4677_v19 = vpop.f32.mrb[56].mxu0 }
 0x506   : > { %v2115_v62 = vpop.f32.mrb[57].mxu0  ;;  %v2157_v63 = vsel %vm1547_vm3, %v4677_v19, -inf }
 0x507   : > { %2158 = vmax.xlane.f32.xlu1 %v2157_v63  ;;  %v2154_v7 = vsel %vm1547_vm3, %v2115_v62, -inf }
 0x508   : > { %2155 = vmax.xlane.f32.xlu0 %v2154_v7 }
 0x509   : > { %v4680_v9 = vpop.f32.mrb[58].mxu0 }
 0x50a   : > { %v2125_v11 = vpop.f32.mrb[59].mxu0  ;;  %v2163_v15 = vsel %vm1547_vm3, %v4680_v9, -inf }
 0x50b   : > { %2164 = vmax.xlane.f32.xlu1 %v2163_v15  ;;  %v2160_v23 = vsel %vm1547_vm3, %v2125_v11, -inf }
 0x50c   : > { %2161 = vmax.xlane.f32.xlu0 %v2160_v23 }
 0x50d   : > { %v4683_v21 = vpop.f32.mrb[60].mxu0 }
 0x50e   : > { %v2135_v17 = vpop.f32.mrb[61].mxu0  ;;  %v2169_v20 = vsel %vm1547_vm3, %v4683_v21, -inf }
 0x50f   : > { %2170 = vmax.xlane.f32.xlu1 %v2169_v20  ;;  %v2166_v1 = vsel %vm1547_vm3, %v2135_v17, -inf }
 0x510   : > { %2167 = vmax.xlane.f32.xlu0 %v2166_v1 }
 0x511   : > { %v4686_v22 = vpop.f32.mrb[62].mxu0 }
 0x512   : > { %v2145_v4 = vpop.f32.mrb[63].mxu0  ;;  %v2175_v24 = vsel %vm1547_vm3, %v4686_v22, -inf }
 0x513   : > { %2176 = vmax.xlane.f32.xlu1 %v2175_v24  ;;  %v2172_v12 = vsel %vm1547_vm3, %v2145_v4, -inf }
 0x514   : > { %2173 = vmax.xlane.f32.xlu0 %v2172_v12 }
 0x594   : > { %v2159_v26 = vpop.xlane.xlu1 %2158 }
 0x595   : > { %v2179_v5 = vsub.f32 %v4677_v19, %v2159_v26  ;;  %v2156_v10 = vpop.xlane.xlu0 %2155 }
 0x596   : > { %v2178_v0 = vsub.f32 %v2115_v62, %v2156_v10 }
 0x597   : > { %v2188_v28 = vmul.f32 1.442695, %v2179_v5 }
 0x598   : > { %v2186_v30 = vmul.f32 1.442695, %v2178_v0  ;;  %v2165_v13 = vpop.xlane.xlu1 %2164 }
 0x599   : > { %5227 = vpow2.f32 %v2188_v28  ;;  %v2181_v35 = vsub.f32 %v4680_v9, %v2165_v13  ;;  %v2162_v29 = vpop.xlane.xlu0 %2161 }
 0x59a   : > { %5229 = vpow2.f32 %v2186_v30  ;;  %v2180_v31 = vsub.f32 %v2125_v11, %v2162_v29 }
 0x59b   : > { %v2192_v34 = vmul.f32 1.442695, %v2181_v35 }
 0x59c   : > { %v2190_v36 = vmul.f32 1.442695, %v2180_v31  ;;  %v2171_v38 = vpop.xlane.xlu1 %2170 }
 0x59d   : > { %5231 = vpow2.f32 %v2192_v34  ;;  %v2183_v40 = vsub.f32 %v4683_v21, %v2171_v38  ;;  %v2168_v42 = vpop.xlane.xlu0 %2167 }
 0x59e   : > { %5233 = vpow2.f32 %v2190_v36  ;;  %v2182_v37 = vsub.f32 %v2135_v17, %v2168_v42 }
 0x59f   : > { %v2196_v27 = vmul.f32 1.442695, %v2183_v40  ;;  %v4741_v40 = vpop.f32.mrb[64].mxu0 }
 0x5a0   : > { %v2194_v41 = vmul.f32 1.442695, %v2182_v37  ;;  %v2177_v43 = vpop.xlane.xlu1 %2176  ;;  %v2591_v42 = vpop.f32.mrb[65].mxu0 }
 0x5a1   : > { %5235 = vpow2.f32 %v2196_v27  ;;  %v2185_v48 = vsub.f32 %v4686_v22, %v2177_v43  ;;  %v2174_v50 = vpop.xlane.xlu0 %2173  ;;  %v4744_v37 = vpop.f32.mrb[66].mxu0 }
 0x5a2   : > { %5237 = vpow2.f32 %v2194_v41  ;;  %v2184_v8 = vsub.f32 %v2145_v4, %v2174_v50  ;;  %v2601_v27 = vpop.f32.mrb[67].mxu0 }
 0x5a3   : > { %v5228_v6 = vpop.eup %5227  ;;  %v2200_v33 = vmul.f32 1.442695, %v2185_v48  ;;  %v4747_v41 = vpop.f32.mrb[68].mxu0 }
 0x5a4   : > { %v5230_v53 = vpop.eup %5229  ;;  %v2198_v55 = vmul.f32 1.442695, %v2184_v8  ;;  %v2205_v57 = vsel %vm1547_vm3, %v5228_v6, 0.0  ;;  %v2611_v43 = vpop.f32.mrb[69].mxu0 }
 0x5a5   : > { %5239 = vpow2.f32 %v2200_v33  ;;  %2206 = vadd.xlane.f32.xlu1 %v2205_v57  ;;  %v2202_v59 = vsel %vm1547_vm3, %v5230_v53, 0.0  ;;  %v4750_v48 = vpop.f32.mrb[70].mxu0 }
 0x5a6   : > { %5241 = vpow2.f32 %v2198_v55  ;;  %2203 = vadd.xlane.f32.xlu0 %v2202_v59  ;;  %v2621_v50 = vpop.f32.mrb[71].mxu0 }
 0x5a7   : > { %v5232_v60 = vpop.eup %5231 }
 0x5a8   : > { %v5234_v14 = vpop.eup %5233  ;;  %v2211_v58 = vsel %vm1547_vm3, %v5232_v60, 0.0 }
 0x5a9   : > { %2212 = vadd.xlane.f32.xlu1 %v2211_v58  ;;  %v2208_v47 = vsel %vm1547_vm3, %v5234_v14, 0.0  ;;  %v6019_v58 = vld [vmem:[%s5424_s11 + $0xd8] sm:$0xff] }
 0x5aa   : > { %2209 = vadd.xlane.f32.xlu0 %v2208_v47  ;;  %v6025_v47 = vld [vmem:[%s5424_s11 + $0xe0] sm:$0xff] }
 0x5ab   : > { %v5236_v61 = vpop.eup %5235 }
 0x5ac   : > { %v5238_v51 = vpop.eup %5237  ;;  %v2217_v54 = vsel %vm1547_vm3, %v5236_v61, 0.0 }
 0x5ad   : > { %2218 = vadd.xlane.f32.xlu1 %v2217_v54  ;;  %v2214_v19 = vsel %vm1547_vm3, %v5238_v51, 0.0 }
 0x5ae   : > { %2215 = vadd.xlane.f32.xlu0 %v2214_v19 }
 0x5af   : > { %v5240_v62 = vpop.eup %5239 }
 0x5b0   : > { %v5242_v63 = vpop.eup %5241  ;;  %v2223_v7 = vsel %vm1547_vm3, %v5240_v62, 0.0 }
 0x5b1   : > { %2224 = vadd.xlane.f32.xlu1 %v2223_v7  ;;  %v2220_v9 = vsel %vm1547_vm3, %v5242_v63, 0.0  ;;  %v5335_v7 = vld [vmem:[%s5424_s11 + $0x40] sm:$0xff] }
 0x5b2   : > { %2221 = vadd.xlane.f32.xlu0 %v2220_v9 }
 0x632   : > { %v2207_v11 = vpop.xlane.xlu1 %2206 }
 0x633   : > { %5243 = vrcp.f32 %v2207_v11  ;;  %v2204_v15 = vpop.xlane.xlu0 %2203 }
 0x634   : > { %5245 = vrcp.f32 %v2204_v15 }
 0x636   : > { %v2213_v23 = vpop.xlane.xlu1 %2212 }
 0x637   : > { %5247 = vrcp.f32 %v2213_v23  ;;  %v2210_v21 = vpop.xlane.xlu0 %2209 }
 0x638   : > { %5249 = vrcp.f32 %v2210_v21  ;;  %v5336_v21 = vld [vmem:[%s5424_s11 + $0x58] sm:$0xff] }
 0x63a   : > { %v2219_v17 = vpop.xlane.xlu1 %2218 }
 0x63b   : > { %5251 = vrcp.f32 %v2219_v17  ;;  %v2216_v20 = vpop.xlane.xlu0 %2215 }
 0x63c   : > { %5253 = vrcp.f32 %v2216_v20  ;;  %v5337_v20 = vld [vmem:[%s5424_s11 + $0x50] sm:$0xff] }
 0x63d   : > { %v5244_v1 = vpop.eup %5243 }
 0x63e   : > { %v5246_v22 = vpop.eup %5245  ;;  %v2225_v4 = vpop.xlane.xlu1 %2224  ;;  %v2229_v26 = vmul.f32 %v5244_v1, %v5228_v6 }
 0x63f   : > { %5255 = vrcp.f32 %v2225_v4  ;;  %v2222_v24 = vpop.xlane.xlu0 %2221  ;;  %v2227_v12 = vmul.f32 %v5246_v22, %v5230_v53 }
 0x640   : > { %5257 = vrcp.f32 %v2222_v24 }
 0x641   : > { %v5248_v5 = vpop.eup %5247  ;;  %4703 = vmatprep.mubr.msk.f32.mxu1 %vm1547_vm3, %v2227_v12 }
 0x642   : > { %v5250_v10 = vpop.eup %5249  ;;  %4704 = vmatmul.mubr.msk.f32.vlgmr.msra.gmra.mrb[48].mxu1 %vm1547_vm3, %v2229_v26  ;;  %v2233_v28 = vmul.f32 %v5248_v5, %v5232_v60  ;;  %v5338_v26 = vld [vmem:[%s5424_s11 + $0x68] sm:$0xff] }
 0x643   : > { %5082 = vmatpush3.bf16.msra.mxu1 %v5808_v32  ;;  %v2231_v0 = vmul.f32 %v5250_v10, %v5234_v14  ;;  %v6007_v14 = vld [vmem:[%s5424_s11 + $0xc8] sm:$0xff]  ;;  %v5339_v10 = vld [vmem:[%s5424_s11 + $0x60] sm:$0xff] }
 0x644   : > { %5093 = vmatprep.subr.msk.bf16.mxu1 %vm5698_vm2, %v5702_v45 }
 0x645   : > { %v5252_v30 = vpop.eup %5251  ;;  %4706 = vmatprep.mubr.msk.f32.mxu1 %vm1547_vm3, %v2231_v0 }
 0x646   : > { %v5254_v13 = vpop.eup %5253  ;;  %4707 = vmatmul.mubr.msk.f32.gmra.mrb[50].mxu1 %vm1547_vm3, %v2233_v28  ;;  %v2237_v29 = vmul.f32 %v5252_v30, %v5236_v61  ;;  %v6037_v61 = vld [vmem:[%s5424_s11 + $0xf0] sm:$0xff] }
 0x647   : > { %v2235_v35 = vmul.f32 %v5254_v13, %v5238_v51 }
 0x649   : > { %v5256_v31 = vpop.eup %5255  ;;  %4709 = vmatprep.mubr.msk.f32.mxu1 %vm1547_vm3, %v2235_v35 }
 0x64a   : > { %v5258_v34 = vpop.eup %5257  ;;  %4710 = vmatmul.mubr.msk.f32.gmra.mrb[52].mxu1 %vm1547_vm3, %v2237_v29  ;;  %v2241_v38 = vmul.f32 %v5256_v31, %v5240_v62  ;;  %v5334_v62 = vld [vmem:[%s5424_s11 + $0x48] sm:$0xff]  ;;  %v5340_v29 = vld [vmem:[%s5424_s11 + $0x78] sm:$0xff] }
 0x64b   : > { %v2239_v36 = vmul.f32 %v5258_v34, %v5242_v63  ;;  %v5341_v34 = vld [vmem:[%s5424_s11 + $0x70] sm:$0xff] }
 0x64d   : > { %4712 = vmatprep.mubr.msk.f32.mxu1 %vm1547_vm3, %v2239_v36 }
 0x64e   : > { %4713 = vmatmul.mubr.msk.f32.gmra.mrb[54].mxu1 %vm1547_vm3, %v2241_v38 }
 0x715   : > { %v4705_v8 = vpop.f32.mrb[48].mxu1 }
 0x716   : > { %v2332_v6 = vpop.f32.mrb[49].mxu1 }
 0x717   : > { %4719 = vmatprep.mubr.msk.f32.mxu1 %vm1765_vm4, %v2332_v6 }
 0x718   : > { %4720 = vmatmul.mubr.msk.f32.vlgmr.msra.gmra.mrb[56].mxu1 %vm1765_vm4, %v4705_v8 }
 0x719   : > { %5096 = vmatpush3.bf16.xpose.msk.msra.mxu1 %vm5698_vm2, %v5702_v45  ;;  %v4708_v33 = vpop.f32.mrb[50].mxu1 }
 0x71a   : > { %5099 = vmatprep.subr.msk.bf16.mxu1 %vm5698_vm2, %v5710_v56  ;;  %v2342_v53 = vpop.f32.mrb[51].mxu1 }
 0x71b   : > { %4722 = vmatprep.mubr.msk.f32.mxu1 %vm1765_vm4, %v2342_v53 }
 0x71c   : > { %4723 = vmatmul.mubr.msk.f32.gmra.mrb[58].mxu1 %vm1765_vm4, %v4708_v33 }
 0x71d   : > { %v4711_v55 = vpop.f32.mrb[52].mxu1 }
 0x71e   : > { %v2352_v57 = vpop.f32.mrb[53].mxu1 }
 0x71f   : > { %4725 = vmatprep.mubr.msk.f32.mxu1 %vm1765_vm4, %v2352_v57 }
 0x720   : > { %4726 = vmatmul.mubr.msk.f32.gmra.mrb[60].mxu1 %vm1765_vm4, %v4711_v55 }
 0x721   : > { %5102 = vmatpush3.bf16.xpose.msk.msra.mxu1 %vm5698_vm2, %v5710_v56  ;;  %v4714_v59 = vpop.f32.mrb[54].mxu1 }
 0x722   : > { %5105 = vmatprep.subr.msk.bf16.mxu1 %vm5698_vm2, %v5715_v2  ;;  %v2362_v60 = vpop.f32.mrb[55].mxu1 }
 0x723   : > { %4728 = vmatprep.mubr.msk.f32.mxu1 %vm1765_vm4, %v2362_v60 }
 0x724   : > { %4729 = vmatmul.mubr.msk.f32.gmra.mrb[62].mxu1 %vm1765_vm4, %v4714_v59 }
 0x725   : > { %4767 = vmatprep.mubr.msk.f32.mxu1 %vm1393_vm1, %v2591_v42 }
 0x729   : > { %5108 = vmatpush3.bf16.xpose.msk.msra.mxu1 %vm5698_vm2, %v5715_v2 }
 0x72a   : > { %5111 = vmatprep.subr.msk.bf16.mxu1 %vm5698_vm2, %v5720_v3 }
 0x731   : > { %5114 = vmatpush3.bf16.xpose.msk.msra.mxu1 %vm5698_vm2, %v5720_v3 }
 0x732   : > { %5136 = vmatprep.subr.bf16.mxu1 %v5617_v46 }
 0x738   : > { %4768 = vmatmul.mubr.msk.f32.vlgmr.msra.gmra.mrb[64].mxu1 %vm1393_vm1, %v4741_v40 }
 0x739   : > { %5138 = vmatpush3.bf16.msra.mxu1 %v5617_v46  ;;  %4770 = vmatprep.mubr.msk.f32.mxu1 %vm1393_vm1, %v2601_v27  ;;  %v6002_v46 = vld [vmem:[%s5424_s11 + $0xc0] sm:$0xff] }
 0x73a   : > { %5140 = vmatprep.subr.bf16.mxu1 %v5650_v49 }
 0x73c   : > { %4771 = vmatmul.mubr.msk.f32.gmra.mrb[66].mxu1 %vm1393_vm1, %v4744_v37 }
 0x73d   : > { %5142 = vmatpush3.bf16.msra.mxu1 %v5650_v49  ;;  %4773 = vmatprep.mubr.msk.f32.mxu1 %vm1393_vm1, %v2611_v43  ;;  %v6013_v49 = vld [vmem:[%s5424_s11 + $0xd0] sm:$0xff] }
 0x73e   : > { %5168 = vmatprep.subr.bf16.mxu1 %v5735_v16 }
 0x740   : > { %4774 = vmatmul.mubr.msk.f32.gmra.mrb[68].mxu1 %vm1393_vm1, %v4747_v41 }
 0x741   : > { %4776 = vmatprep.mubr.msk.f32.mxu1 %vm1393_vm1, %v2621_v50 }
 0x744   : > { %4777 = vmatmul.mubr.msk.f32.gmra.mrb[70].mxu1 %vm1393_vm1, %v4750_v48 }
 0x745   : > { %4831 = vmatprep.mubr.msk.f32.mxu1 %vm303_vm0, %v6002_v46 }
 0x748   : > { %4832 = vmatmul.mubr.msk.f32.vlgmr.msra.gmra.mrb[72].mxu1 %vm303_vm0, %v6007_v14 }
 0x749   : > { %5170 = vmatpush3.bf16.msra.mxu1 %v5735_v16  ;;  %4834 = vmatprep.mubr.msk.f32.mxu1 %vm303_vm0, %v6013_v49  ;;  %v6031_v16 = vld [vmem:[%s5424_s11 + $0xe8] sm:$0xff] }
 0x74a   : > { %5172 = vmatprep.subr.bf16.mxu1 %v5739_v18 }
 0x74c   : > { %4835 = vmatmul.mubr.msk.f32.gmra.mrb[74].mxu1 %vm303_vm0, %v6019_v58 }
 0x74d   : > { %5174 = vmatpush3.bf16.msra.mxu1 %v5739_v18  ;;  %4837 = vmatprep.mubr.msk.f32.mxu1 %vm303_vm0, %v6025_v47  ;;  %v6043_v18 = vld [vmem:[%s5424_s11 + $0xf8] sm:$0xff] }
 0x74e   : > { %5176 = vmatprep.subr.bf16.mxu1 %v5743_v52 }
 0x750   : > { %4838 = vmatmul.mubr.msk.f32.gmra.mrb[76].mxu1 %vm303_vm0, %v6031_v16 }
 0x751   : > { %5178 = vmatpush3.bf16.msra.mxu1 %v5743_v52  ;;  %4840 = vmatprep.mubr.msk.f32.mxu1 %vm303_vm0, %v6037_v61 }
 0x752   : > { %5180 = vmatprep.subr.bf16.mxu1 %v5747_v39 }
 0x754   : > { %4841 = vmatmul.mubr.msk.f32.gmra.mrb[78].mxu1 %vm303_vm0, %v6043_v18 }
 0x755   : > { %5182 = vmatpush3.bf16.msra.mxu1 %v5747_v39 }
 0x756   : > { %5184 = vmatprep.subr.bf16.mxu1 %v5808_v32 }
 0x7eb   : > { %v4721_v52 = vpop.f32.mrb[56].mxu1 }
 0x7ec   : > { %v2501_v51 = vmul.f32 %v4721_v52, %v5890_v25  ;;  %v2461_v54 = vpop.f32.mrb[57].mxu1 }
 0x7ed   : > { %v2500_v19 = vmul.f32 %v2461_v54, %v5890_v25 }
 0x7ee   : > { %v2509_v63 = vadd.f32 %v5334_v62, %v2501_v51 }
 0x7ef   : > { %v2508_v9 = vadd.f32 %v5335_v7, %v2500_v19  ;;  %v4724_v11 = vpop.f32.mrb[58].mxu1 }
 0x7f0   : > { %3968 = vst.msk [vmem:[%s5898_s14 + $0x48] sm:$0xff] %vm303_vm0, %v2509_v63  ;;  %v2503_v39 = vmul.f32 %v4724_v11, %v5890_v25  ;;  %v2471_v15 = vpop.f32.mrb[59].mxu1 }
 0x7f1   : > { %3967 = vst.msk [vmem:[%s5898_s14 + $0x40] sm:$0xff] %vm303_vm0, %v2508_v9  ;;  %v2502_v23 = vmul.f32 %v2471_v15, %v5890_v25 }
 0x7f2   : > { %v2511_v17 = vadd.f32 %v5336_v21, %v2503_v39 }
 0x7f3   : > { %v2510_v1 = vadd.f32 %v5337_v20, %v2502_v23  ;;  %v4727_v22 = vpop.f32.mrb[60].mxu1 }
 0x7f4   : > { %3970 = vst.msk [vmem:[%s5898_s14 + $0x58] sm:$0xff] %vm303_vm0, %v2511_v17  ;;  %v2505_v4 = vmul.f32 %v4727_v22, %v5890_v25  ;;  %v2481_v24 = vpop.f32.mrb[61].mxu1 }
 0x7f5   : > { %3969 = vst.msk [vmem:[%s5898_s14 + $0x50] sm:$0xff] %vm303_vm0, %v2510_v1  ;;  %v2504_v12 = vmul.f32 %v2481_v24, %v5890_v25 }
 0x7f6   : > { %v2513_v5 = vadd.f32 %v5338_v26, %v2505_v4 }
 0x7f7   : > { %v2512_v0 = vadd.f32 %v5339_v10, %v2504_v12  ;;  %v4730_v28 = vpop.f32.mrb[62].mxu1 }
 0x7f8   : > { %3972 = vst.msk [vmem:[%s5898_s14 + $0x68] sm:$0xff] %vm303_vm0, %v2513_v5  ;;  %v2507_v30 = vmul.f32 %v4730_v28, %v5890_v25  ;;  %v2491_v13 = vpop.f32.mrb[63].mxu1 }
 0x7f9   : > { %3971 = vst.msk [vmem:[%s5898_s14 + $0x60] sm:$0xff] %vm303_vm0, %v2512_v0  ;;  %v2506_v35 = vmul.f32 %v2491_v13, %v5890_v25 }
 0x7fa   : > { %v2515_v31 = vadd.f32 %v5340_v29, %v2507_v30 }
 0x7fb   : > { %v2514_v36 = vadd.f32 %v5341_v34, %v2506_v35 }
 0x7fc   : > { %3974 = vst.msk [vmem:[%s5898_s14 + $0x78] sm:$0xff] %vm303_vm0, %v2515_v31 }
 0x7fd   : > { %3973 = vst.msk [vmem:[%s5898_s14 + $0x70] sm:$0xff] %vm303_vm0, %v2514_v36 }
 0x80b   : > { %v4769_v38 = vpop.f32.mrb[64].mxu1 }
 0x80c   : > { %v2720_v40 = vpop.f32.mrb[65].mxu1  ;;  %v2762_v42 = vsel %vm1547_vm3, %v4769_v38, -inf }
 0x80d   : > { %2763 = vmax.xlane.f32.xlu1 %v2762_v42  ;;  %v2759_v37 = vsel %vm1547_vm3, %v2720_v40, -inf }
 0x80e   : > { %2760 = vmax.xlane.f32.xlu0 %v2759_v37 }
 0x80f   : > { %v4772_v27 = vpop.f32.mrb[66].mxu1 }
 0x810   : > { %v2730_v41 = vpop.f32.mrb[67].mxu1  ;;  %v2768_v43 = vsel %vm1547_vm3, %v4772_v27, -inf }
 0x811   : > { %2769 = vmax.xlane.f32.xlu1 %v2768_v43  ;;  %v2765_v48 = vsel %vm1547_vm3, %v2730_v41, -inf }
 0x812   : > { %2766 = vmax.xlane.f32.xlu0 %v2765_v48 }
 0x813   : > { %v4775_v50 = vpop.f32.mrb[68].mxu1 }
 0x814   : > { %v2740_v8 = vpop.f32.mrb[69].mxu1  ;;  %v2774_v6 = vsel %vm1547_vm3, %v4775_v50, -inf }
 0x815   : > { %2775 = vmax.xlane.f32.xlu1 %v2774_v6  ;;  %v2771_v33 = vsel %vm1547_vm3, %v2740_v8, -inf }
 0x816   : > { %2772 = vmax.xlane.f32.xlu0 %v2771_v33 }
 0x817   : > { %v4778_v53 = vpop.f32.mrb[70].mxu1 }
 0x818   : > { %v2750_v55 = vpop.f32.mrb[71].mxu1  ;;  %v2780_v57 = vsel %vm1547_vm3, %v4778_v53, -inf }
 0x819   : > { %2781 = vmax.xlane.f32.xlu1 %v2780_v57  ;;  %v2777_v59 = vsel %vm1547_vm3, %v2750_v55, -inf }
 0x81a   : > { %2778 = vmax.xlane.f32.xlu0 %v2777_v59 }
 0x89a   : > { %v2764_v60 = vpop.xlane.xlu1 %2763 }
 0x89b   : > { %v2784_v52 = vsub.f32 %v4769_v38, %v2764_v60  ;;  %v2761_v51 = vpop.xlane.xlu0 %2760 }
 0x89c   : > { %v2783_v54 = vsub.f32 %v2720_v40, %v2761_v51 }
 0x89d   : > { %v2793_v19 = vmul.f32 1.442695, %v2784_v52 }
 0x89e   : > { %v2791_v62 = vmul.f32 1.442695, %v2783_v54  ;;  %v2770_v63 = vpop.xlane.xlu1 %2769 }
 0x89f   : > { %5259 = vpow2.f32 %v2793_v19  ;;  %v2786_v7 = vsub.f32 %v4772_v27, %v2770_v63  ;;  %v2767_v9 = vpop.xlane.xlu0 %2766 }
 0x8a0   : > { %5261 = vpow2.f32 %v2791_v62  ;;  %v2785_v11 = vsub.f32 %v2730_v41, %v2767_v9 }
 0x8a1   : > { %v2797_v39 = vmul.f32 1.442695, %v2786_v7 }
 0x8a2   : > { %v2795_v15 = vmul.f32 1.442695, %v2785_v11  ;;  %v2776_v23 = vpop.xlane.xlu1 %2775 }
 0x8a3   : > { %5263 = vpow2.f32 %v2797_v39  ;;  %v2788_v21 = vsub.f32 %v4775_v50, %v2776_v23  ;;  %v2773_v17 = vpop.xlane.xlu0 %2772 }
 0x8a4   : > { %5265 = vpow2.f32 %v2795_v15  ;;  %v2787_v20 = vsub.f32 %v2740_v8, %v2773_v17 }
 0x8a5   : > { %v2801_v1 = vmul.f32 1.442695, %v2788_v21 }
 0x8a6   : > { %v2799_v22 = vmul.f32 1.442695, %v2787_v20  ;;  %v2782_v4 = vpop.xlane.xlu1 %2781  ;;  %v4833_v20 = vpop.f32.mrb[72].mxu1 }
 0x8a7   : > { %5267 = vpow2.f32 %v2801_v1  ;;  %v2790_v24 = vsub.f32 %v4778_v53, %v2782_v4  ;;  %v2779_v12 = vpop.xlane.xlu0 %2778  ;;  %v3196_v1 = vpop.f32.mrb[73].mxu1 }
 0x8a8   : > { %5269 = vpow2.f32 %v2799_v22  ;;  %v2789_v26 = vsub.f32 %v2750_v55, %v2779_v12  ;;  %v4836_v22 = vpop.f32.mrb[74].mxu1 }
 0x8a9   : > { %v5260_v5 = vpop.eup %5259  ;;  %v2805_v10 = vmul.f32 1.442695, %v2790_v24  ;;  %v3206_v4 = vpop.f32.mrb[75].mxu1 }
 0x8aa   : > { %v5262_v0 = vpop.eup %5261  ;;  %v2803_v28 = vmul.f32 1.442695, %v2789_v26  ;;  %v2810_v30 = vsel %vm1547_vm3, %v5260_v5, 0.0  ;;  %v4839_v24 = vpop.f32.mrb[76].mxu1 }
 0x8ab   : > { %5271 = vpow2.f32 %v2805_v10  ;;  %2811 = vadd.xlane.f32.xlu1 %v2810_v30  ;;  %v2807_v13 = vsel %vm1547_vm3, %v5262_v0, 0.0  ;;  %v3216_v12 = vpop.f32.mrb[77].mxu1 }
 0x8ac   : > { %5273 = vpow2.f32 %v2803_v28  ;;  %2808 = vadd.xlane.f32.xlu0 %v2807_v13  ;;  %v4842_v26 = vpop.f32.mrb[78].mxu1 }
 0x8ad   : > { %v5264_v35 = vpop.eup %5263 }
 0x8ae   : > { %v5266_v29 = vpop.eup %5265  ;;  %v2816_v31 = vsel %vm1547_vm3, %v5264_v35, 0.0 }
 0x8af   : > { %2817 = vadd.xlane.f32.xlu1 %v2816_v31  ;;  %v2813_v34 = vsel %vm1547_vm3, %v5266_v29, 0.0  ;;  %v5342_v31 = vld [vmem:[%s5424_s11 + $0x88] sm:$0xff] }
 0x8b0   : > { %2814 = vadd.xlane.f32.xlu0 %v2813_v34 }
 0x8b1   : > { %v5268_v36 = vpop.eup %5267 }
 0x8b2   : > { %v5270_v38 = vpop.eup %5269  ;;  %v2822_v40 = vsel %vm1547_vm3, %v5268_v36, 0.0 }
 0x8b3   : > { %2823 = vadd.xlane.f32.xlu1 %v2822_v40  ;;  %v2819_v42 = vsel %vm1547_vm3, %v5270_v38, 0.0 }
 0x8b4   : > { %2820 = vadd.xlane.f32.xlu0 %v2819_v42 }
 0x8b5   : > { %v5272_v37 = vpop.eup %5271 }
 0x8b6   : > { %v5274_v27 = vpop.eup %5273  ;;  %v2828_v41 = vsel %vm1547_vm3, %v5272_v37, 0.0 }
 0x8b7   : > { %2829 = vadd.xlane.f32.xlu1 %v2828_v41  ;;  %v2825_v43 = vsel %vm1547_vm3, %v5274_v27, 0.0  ;;  %v5344_v41 = vld [vmem:[%s5424_s11 + $0x98] sm:$0xff] }
 0x8b8   : > { %2826 = vadd.xlane.f32.xlu0 %v2825_v43 }
 0x938   : > { %v2812_v48 = vpop.xlane.xlu1 %2811 }
 0x939   : > { %5275 = vrcp.f32 %v2812_v48  ;;  %v2809_v50 = vpop.xlane.xlu0 %2808  ;;  %v5345_v48 = vld [vmem:[%s5424_s11 + $0x90] sm:$0xff] }
 0x93a   : > { %5277 = vrcp.f32 %v2809_v50 }
 0x93c   : > { %v2818_v8 = vpop.xlane.xlu1 %2817 }
 0x93d   : > { %5279 = vrcp.f32 %v2818_v8  ;;  %v2815_v6 = vpop.xlane.xlu0 %2814 }
 0x93e   : > { %5281 = vrcp.f32 %v2815_v6 }
 0x940   : > { %v2824_v33 = vpop.xlane.xlu1 %2823 }
 0x941   : > { %5283 = vrcp.f32 %v2824_v33  ;;  %v2821_v53 = vpop.xlane.xlu0 %2820 }
 0x942   : > { %5285 = vrcp.f32 %v2821_v53 }
 0x943   : > { %v5276_v55 = vpop.eup %5275 }
 0x944   : > { %v5278_v57 = vpop.eup %5277  ;;  %v2830_v59 = vpop.xlane.xlu1 %2829  ;;  %v2834_v51 = vmul.f32 %v5276_v55, %v5260_v5  ;;  %v5346_v55 = vld [vmem:[%s5424_s11 + $0xa8] sm:$0xff] }
 0x945   : > { %5287 = vrcp.f32 %v2830_v59  ;;  %v2827_v60 = vpop.xlane.xlu0 %2826  ;;  %v2832_v52 = vmul.f32 %v5278_v57, %v5262_v0  ;;  %v3226_v5 = vpop.f32.mrb[79].mxu1  ;;  %v5347_v59 = vld [vmem:[%s5424_s11 + $0xa0] sm:$0xff] }
 0x946   : > { %5289 = vrcp.f32 %v2827_v60 }
 0x947   : > { %v5280_v54 = vpop.eup %5279  ;;  %4795 = vmatprep.mubr.msk.f32.mxu0 %vm1547_vm3, %v2832_v52 }
 0x948   : > { %v5282_v19 = vpop.eup %5281  ;;  %4796 = vmatmul.mubr.msk.f32.vlgmr.msra.gmra.mrb[72].mxu0 %vm1547_vm3, %v2834_v51  ;;  %v2838_v63 = vmul.f32 %v5280_v54, %v5264_v35 }
 0x949   : > { %5134 = vmatpush3.bf16.msra.mxu0 %v5808_v32  ;;  %v2836_v62 = vmul.f32 %v5282_v19, %v5266_v29 }
 0x94a   : > { %5145 = vmatprep.subr.msk.bf16.mxu0 %vm5698_vm2, %v5702_v45 }
 0x94b   : > { %v5284_v7 = vpop.eup %5283  ;;  %4798 = vmatprep.mubr.msk.f32.mxu0 %vm1547_vm3, %v2836_v62  ;;  %v5348_v62 = vld [vmem:[%s5424_s11 + $0xb8] sm:$0xff] }
 0x94c   : > { %v5286_v9 = vpop.eup %5285  ;;  %4799 = vmatmul.mubr.msk.f32.gmra.mrb[74].mxu0 %vm1547_vm3, %v2838_v63  ;;  %v2842_v39 = vmul.f32 %v5284_v7, %v5268_v36  ;;  %v5343_v36 = vld [vmem:[%s5424_s11 + $0x80] sm:$0xff]  ;;  %v5349_v7 = vld [vmem:[%s5424_s11 + $0xb0] sm:$0xff] }
 0x94d   : > { %v2840_v11 = vmul.f32 %v5286_v9, %v5270_v38 }
 0x94f   : > { %v5288_v15 = vpop.eup %5287  ;;  %4801 = vmatprep.mubr.msk.f32.mxu0 %vm1547_vm3, %v2840_v11 }
 0x950   : > { %v5290_v23 = vpop.eup %5289  ;;  %4802 = vmatmul.mubr.msk.f32.gmra.mrb[76].mxu0 %vm1547_vm3, %v2842_v39  ;;  %v2846_v17 = vmul.f32 %v5288_v15, %v5272_v37 }
 0x951   : > { %v2844_v21 = vmul.f32 %v5290_v23, %v5274_v27 }
 0x953   : > { %4804 = vmatprep.mubr.msk.f32.mxu0 %vm1547_vm3, %v2844_v21 }
 0x954   : > { %4805 = vmatmul.mubr.msk.f32.gmra.mrb[78].mxu0 %vm1547_vm3, %v2846_v17 }
 0xa1b   : > { %v4797_v10 = vpop.f32.mrb[72].mxu0 }
 0xa1c   : > { %v2937_v0 = vpop.f32.mrb[73].mxu0 }
 0xa1d   : > { %4811 = vmatprep.mubr.msk.f32.mxu0 %vm1765_vm4, %v2937_v0 }
 0xa1e   : > { %4812 = vmatmul.mubr.msk.f32.vlgmr.msra.gmra.mrb[80].mxu0 %vm1765_vm4, %v4797_v10 }
 0xa1f   : > { %5148 = vmatpush3.bf16.xpose.msk.msra.mxu0 %vm5698_vm2, %v5702_v45  ;;  %v4800_v28 = vpop.f32.mrb[74].mxu0 }
 0xa20   : > { %5151 = vmatprep.subr.msk.bf16.mxu0 %vm5698_vm2, %v5710_v56  ;;  %v2947_v30 = vpop.f32.mrb[75].mxu0 }
 0xa21   : > { %4814 = vmatprep.mubr.msk.f32.mxu0 %vm1765_vm4, %v2947_v30 }
 0xa22   : > { %4815 = vmatmul.mubr.msk.f32.gmra.mrb[82].mxu0 %vm1765_vm4, %v4800_v28 }
 0xa23   : > { %v4803_v13 = vpop.f32.mrb[76].mxu0 }
 0xa24   : > { %v2957_v35 = vpop.f32.mrb[77].mxu0 }
 0xa25   : > { %4817 = vmatprep.mubr.msk.f32.mxu0 %vm1765_vm4, %v2957_v35 }
 0xa26   : > { %4818 = vmatmul.mubr.msk.f32.gmra.mrb[84].mxu0 %vm1765_vm4, %v4803_v13 }
 0xa27   : > { %5154 = vmatpush3.bf16.xpose.msk.msra.mxu0 %vm5698_vm2, %v5710_v56  ;;  %v4806_v45 = vpop.f32.mrb[78].mxu0 }
 0xa28   : > { %5157 = vmatprep.subr.msk.bf16.mxu0 %vm5698_vm2, %v5715_v2  ;;  %v2967_v29 = vpop.f32.mrb[79].mxu0 }
 0xa29   : > { %4820 = vmatprep.mubr.msk.f32.mxu0 %vm1765_vm4, %v2967_v29 }
 0xa2a   : > { %4821 = vmatmul.mubr.msk.f32.gmra.mrb[86].mxu0 %vm1765_vm4, %v4806_v45 }
 0xa2b   : > { %4859 = vmatprep.mubr.msk.f32.mxu0 %vm1393_vm1, %v3196_v1 }
 0xa2f   : > { %5160 = vmatpush3.bf16.xpose.msk.msra.mxu0 %vm5698_vm2, %v5715_v2 }
 0xa30   : > { %5163 = vmatprep.subr.msk.bf16.mxu0 %vm5698_vm2, %v5720_v3 }
 0xa37   : > { %5166 = vmatpush3.bf16.xpose.msk.msra.mxu0 %vm5698_vm2, %v5720_v3 }
 0xa3e   : > { %4860 = vmatmul.mubr.msk.f32.vlgmr.msra.gmra.mrb[88].mxu0 %vm1393_vm1, %v4833_v20 }
 0xa3f   : > { %4862 = vmatprep.mubr.msk.f32.mxu0 %vm1393_vm1, %v3206_v4 }
 0xa42   : > { %4863 = vmatmul.mubr.msk.f32.gmra.mrb[90].mxu0 %vm1393_vm1, %v4836_v22 }
 0xa43   : > { %4865 = vmatprep.mubr.msk.f32.mxu0 %vm1393_vm1, %v3216_v12 }
 0xa46   : > { %4866 = vmatmul.mubr.msk.f32.gmra.mrb[92].mxu0 %vm1393_vm1, %v4839_v24 }
 0xa47   : > { %4868 = vmatprep.mubr.msk.f32.mxu0 %vm1393_vm1, %v3226_v5 }
 0xa4a   : > { %4869 = vmatmul.mubr.msk.f32.gmra.mrb[94].mxu0 %vm1393_vm1, %v4842_v26 }
 0xaf1   : > { %v4813_v56 = vpop.f32.mrb[80].mxu0 }
 0xaf2   : > { %v3106_v44 = vmul.f32 %v4813_v56, %v5890_v25  ;;  %v3066_v2 = vpop.f32.mrb[81].mxu0 }
 0xaf3   : > { %v3105_v3 = vmul.f32 %v3066_v2, %v5890_v25 }
 0xaf4   : > { %v3114_v34 = vadd.f32 %v5342_v31, %v3106_v44 }
 0xaf5   : > { %v3113_v38 = vadd.f32 %v5343_v36, %v3105_v3  ;;  %v4816_v40 = vpop.f32.mrb[82].mxu0 }
 0xaf6   : > { %4016 = vst.msk [vmem:[%s5898_s14 + $0x88] sm:$0xff] %vm303_vm0, %v3114_v34  ;;  %v3108_v42 = vmul.f32 %v4816_v40, %v5890_v25  ;;  %v3076_v37 = vpop.f32.mrb[83].mxu0 }
 0xaf7   : > { %4015 = vst.msk [vmem:[%s5898_s14 + $0x80] sm:$0xff] %vm303_vm0, %v3113_v38  ;;  %v3107_v27 = vmul.f32 %v3076_v37, %v5890_v25 }
 0xaf8   : > { %v3116_v43 = vadd.f32 %v5344_v41, %v3108_v42 }
 0xaf9   : > { %v3115_v50 = vadd.f32 %v5345_v48, %v3107_v27  ;;  %v4819_v8 = vpop.f32.mrb[84].mxu0 }
 0xafa   : > { %4018 = vst.msk [vmem:[%s5898_s14 + $0x98] sm:$0xff] %vm303_vm0, %v3116_v43  ;;  %v3110_v6 = vmul.f32 %v4819_v8, %v5890_v25  ;;  %v3086_v33 = vpop.f32.mrb[85].mxu0 }
 0xafb   : > { %4017 = vst.msk [vmem:[%s5898_s14 + $0x90] sm:$0xff] %vm303_vm0, %v3115_v50  ;;  %v3109_v53 = vmul.f32 %v3086_v33, %v5890_v25 }
 0xafc   : > { %v3118_v57 = vadd.f32 %v5346_v55, %v3110_v6 }
 0xafd   : > { %v3117_v60 = vadd.f32 %v5347_v59, %v3109_v53  ;;  %v4822_v52 = vpop.f32.mrb[86].mxu0 }
 0xafe   : > { %4020 = vst.msk [vmem:[%s5898_s14 + $0xa8] sm:$0xff] %vm303_vm0, %v3118_v57  ;;  %v3112_v51 = vmul.f32 %v4822_v52, %v5890_v25  ;;  %v3096_v54 = vpop.f32.mrb[87].mxu0 }
 0xaff   : > { %4019 = vst.msk [vmem:[%s5898_s14 + $0xa0] sm:$0xff] %vm303_vm0, %v3117_v60  ;;  %v3111_v19 = vmul.f32 %v3096_v54, %v5890_v25 }
 0xb00   : > { %v3120_v63 = vadd.f32 %v5348_v62, %v3112_v51 }
 0xb01   : > { %v3119_v9 = vadd.f32 %v5349_v7, %v3111_v19 }
 0xb02   : > { %4022 = vst.msk [vmem:[%s5898_s14 + $0xb8] sm:$0xff] %vm303_vm0, %v3120_v63 }
 0xb03   : > { %4021 = vst.msk [vmem:[%s5898_s14 + $0xb0] sm:$0xff] %vm303_vm0, %v3119_v9 }
 0xb11   : > { %v4861_v11 = vpop.f32.mrb[88].mxu0 }
 0xb12   : > { %v3325_v39 = vpop.f32.mrb[89].mxu0  ;;  %v3367_v15 = vsel %vm1547_vm3, %v4861_v11, -inf }
 0xb13   : > { %3368 = vmax.xlane.f32.xlu1 %v3367_v15  ;;  %v3364_v23 = vsel %vm1547_vm3, %v3325_v39, -inf }
 0xb14   : > { %3365 = vmax.xlane.f32.xlu0 %v3364_v23 }
 0xb15   : > { %v4864_v21 = vpop.f32.mrb[90].mxu0 }
 0xb16   : > { %v3335_v17 = vpop.f32.mrb[91].mxu0  ;;  %v3373_v20 = vsel %vm1547_vm3, %v4864_v21, -inf }
 0xb17   : > { %3374 = vmax.xlane.f32.xlu1 %v3373_v20  ;;  %v3370_v1 = vsel %vm1547_vm3, %v3335_v17, -inf }
 0xb18   : > { %3371 = vmax.xlane.f32.xlu0 %v3370_v1 }
 0xb19   : > { %v4867_v22 = vpop.f32.mrb[92].mxu0 }
 0xb1a   : > { %v3345_v4 = vpop.f32.mrb[93].mxu0  ;;  %v3379_v24 = vsel %vm1547_vm3, %v4867_v22, -inf }
 0xb1b   : > { %3380 = vmax.xlane.f32.xlu1 %v3379_v24  ;;  %v3376_v12 = vsel %vm1547_vm3, %v3345_v4, -inf }
 0xb1c   : > { %3377 = vmax.xlane.f32.xlu0 %v3376_v12 }
 0xb1d   : > { %v4870_v26 = vpop.f32.mrb[94].mxu0 }
 0xb1e   : > { %v3355_v5 = vpop.f32.mrb[95].mxu0  ;;  %v3385_v10 = vsel %vm1547_vm3, %v4870_v26, -inf }
 0xb1f   : > { %3386 = vmax.xlane.f32.xlu1 %v3385_v10  ;;  %v3382_v0 = vsel %vm1547_vm3, %v3355_v5, -inf }
 0xb20   : > { %3383 = vmax.xlane.f32.xlu0 %v3382_v0 }
 0xba0   : > { %v3369_v28 = vpop.xlane.xlu1 %3368 }
 0xba1   : > { %v3389_v30 = vsub.f32 %v4861_v11, %v3369_v28  ;;  %v3366_v13 = vpop.xlane.xlu0 %3365 }
 0xba2   : > { %v3388_v35 = vsub.f32 %v3325_v39, %v3366_v13 }
 0xba3   : > { %v3398_v45 = vmul.f32 1.442695, %v3389_v30 }
 0xba4   : > { %v3396_v29 = vmul.f32 1.442695, %v3388_v35  ;;  %v3375_v56 = vpop.xlane.xlu1 %3374 }
 0xba5   : > { %5291 = vpow2.f32 %v3398_v45  ;;  %v3391_v44 = vsub.f32 %v4864_v21, %v3375_v56  ;;  %v3372_v2 = vpop.xlane.xlu0 %3371 }
 0xba6   : > { %5293 = vpow2.f32 %v3396_v29  ;;  %v3390_v3 = vsub.f32 %v3335_v17, %v3372_v2 }
 0xba7   : > { %v3402_v31 = vmul.f32 1.442695, %v3391_v44 }
 0xba8   : > { %v3400_v34 = vmul.f32 1.442695, %v3390_v3  ;;  %v3381_v36 = vpop.xlane.xlu1 %3380 }
 0xba9   : > { %5295 = vpow2.f32 %v3402_v31  ;;  %v3393_v38 = vsub.f32 %v4867_v22, %v3381_v36  ;;  %v3378_v40 = vpop.xlane.xlu0 %3377 }
 0xbaa   : > { %5297 = vpow2.f32 %v3400_v34  ;;  %v3392_v42 = vsub.f32 %v3345_v4, %v3378_v40 }
 0xbab   : > { %v3406_v37 = vmul.f32 1.442695, %v3393_v38 }
 0xbac   : > { %v3404_v27 = vmul.f32 1.442695, %v3392_v42  ;;  %v3387_v41 = vpop.xlane.xlu1 %3386 }
 0xbad   : > { %5299 = vpow2.f32 %v3406_v37  ;;  %v3395_v43 = vsub.f32 %v4870_v26, %v3387_v41  ;;  %v3384_v48 = vpop.xlane.xlu0 %3383 }
 0xbae   : > { %5301 = vpow2.f32 %v3404_v27  ;;  %v3394_v50 = vsub.f32 %v3355_v5, %v3384_v48 }
 0xbaf   : > { %v5292_v8 = vpop.eup %5291  ;;  %v3410_v6 = vmul.f32 1.442695, %v3395_v43 }
 0xbb0   : > { %v5294_v33 = vpop.eup %5293  ;;  %v3408_v53 = vmul.f32 1.442695, %v3394_v50  ;;  %v3415_v55 = vsel %vm1547_vm3, %v5292_v8, 0.0 }
 0xbb1   : > { %5303 = vpow2.f32 %v3410_v6  ;;  %3416 = vadd.xlane.f32.xlu1 %v3415_v55  ;;  %v3412_v57 = vsel %vm1547_vm3, %v5294_v33, 0.0 }
 0xbb2   : > { %5305 = vpow2.f32 %v3408_v53  ;;  %3413 = vadd.xlane.f32.xlu0 %v3412_v57 }
 0xbb3   : > { %v5296_v59 = vpop.eup %5295 }
 0xbb4   : > { %v5298_v60 = vpop.eup %5297  ;;  %v3421_v52 = vsel %vm1547_vm3, %v5296_v59, 0.0 }
 0xbb5   : > { %3422 = vadd.xlane.f32.xlu1 %v3421_v52  ;;  %v3418_v51 = vsel %vm1547_vm3, %v5298_v60, 0.0 }
 0xbb6   : > { %3419 = vadd.xlane.f32.xlu0 %v3418_v51 }
 0xbb7   : > { %v5300_v54 = vpop.eup %5299 }
 0xbb8   : > { %v5302_v19 = vpop.eup %5301  ;;  %v3427_v62 = vsel %vm1547_vm3, %v5300_v54, 0.0 }
 0xbb9   : > { %3428 = vadd.xlane.f32.xlu1 %v3427_v62  ;;  %v3424_v63 = vsel %vm1547_vm3, %v5302_v19, 0.0 }
 0xbba   : > { %3425 = vadd.xlane.f32.xlu0 %v3424_v63 }
 0xbbb   : > { %v5304_v7 = vpop.eup %5303 }
 0xbbc   : > { %v5306_v9 = vpop.eup %5305  ;;  %v3433_v11 = vsel %vm1547_vm3, %v5304_v7, 0.0 }
 0xbbd   : > { %3434 = vadd.xlane.f32.xlu1 %v3433_v11  ;;  %v3430_v39 = vsel %vm1547_vm3, %v5306_v9, 0.0 }
 0xbbe   : > { %3431 = vadd.xlane.f32.xlu0 %v3430_v39 }
 0xc3e   : > { %v3417_v15 = vpop.xlane.xlu1 %3416 }
 0xc3f   : > { %5307 = vrcp.f32 %v3417_v15  ;;  %v3414_v23 = vpop.xlane.xlu0 %3413 }
 0xc40   : > { %5309 = vrcp.f32 %v3414_v23 }
 0xc42   : > { %v3423_v21 = vpop.xlane.xlu1 %3422 }
 0xc43   : > { %5311 = vrcp.f32 %v3423_v21  ;;  %v3420_v17 = vpop.xlane.xlu0 %3419 }
 0xc44   : > { %5313 = vrcp.f32 %v3420_v17 }
 0xc46   : > { %v3429_v20 = vpop.xlane.xlu1 %3428 }
 0xc47   : > { %5315 = vrcp.f32 %v3429_v20  ;;  %v3426_v1 = vpop.xlane.xlu0 %3425 }
 0xc48   : > { %5317 = vrcp.f32 %v3426_v1 }
 0xc49   : > { %v5308_v22 = vpop.eup %5307 }
 0xc4a   : > { %v5310_v4 = vpop.eup %5309  ;;  %v3435_v24 = vpop.xlane.xlu1 %3434  ;;  %v3439_v5 = vmul.f32 %v5308_v22, %v5292_v8 }
 0xc4b   : > { %5319 = vrcp.f32 %v3435_v24  ;;  %v3432_v12 = vpop.xlane.xlu0 %3431  ;;  %v3437_v26 = vmul.f32 %v5310_v4, %v5294_v33 }
 0xc4c   : > { %5321 = vrcp.f32 %v3432_v12 }
 0xc4d   : > { %v5312_v10 = vpop.eup %5311  ;;  %4887 = vmatprep.mubr.msk.f32.mxu1 %vm1547_vm3, %v3437_v26 }
 0xc4e   : > { %v5314_v0 = vpop.eup %5313  ;;  %4888 = vmatmul.mubr.msk.f32.vlgmr.msra.gmra.mrb[80].mxu1 %vm1547_vm3, %v3439_v5  ;;  %v3443_v30 = vmul.f32 %v5312_v10, %v5296_v59 }
 0xc4f   : > { %v3441_v28 = vmul.f32 %v5314_v0, %v5298_v60  ;;  %5186 = vmatpush3.bf16.msra.mxu1 %v5808_v32 }
 0xc51   : > { %v5316_v13 = vpop.eup %5315  ;;  %4890 = vmatprep.mubr.msk.f32.mxu1 %vm1547_vm3, %v3441_v28 }
 0xc52   : > { %v5318_v35 = vpop.eup %5317  ;;  %4891 = vmatmul.mubr.msk.f32.gmra.mrb[82].mxu1 %vm1547_vm3, %v3443_v30  ;;  %v3447_v29 = vmul.f32 %v5316_v13, %v5300_v54 }
 0xc53   : > { %v3445_v45 = vmul.f32 %v5318_v35, %v5302_v19 }
 0xc55   : > { %v5320_v56 = vpop.eup %5319  ;;  %4893 = vmatprep.mubr.msk.f32.mxu1 %vm1547_vm3, %v3445_v45 }
 0xc56   : > { %v5322_v44 = vpop.eup %5321  ;;  %4894 = vmatmul.mubr.msk.f32.gmra.mrb[84].mxu1 %vm1547_vm3, %v3447_v29  ;;  %v3451_v3 = vmul.f32 %v5320_v56, %v5304_v7 }
 0xc57   : > { %v3449_v2 = vmul.f32 %v5322_v44, %v5306_v9 }
 0xc59   : > { %4896 = vmatprep.mubr.msk.f32.mxu1 %vm1547_vm3, %v3449_v2 }
 0xc5a   : > { %4897 = vmatmul.mubr.msk.f32.gmra.mrb[86].mxu1 %vm1547_vm3, %v3451_v3 }
 0xd21   : > { %v4889_v32 = vpop.f32.mrb[80].mxu1 }
 0xd22   : > { %v3542_v31 = vpop.f32.mrb[81].mxu1 }
 0xd23   : > { %4903 = vmatprep.mubr.msk.f32.mxu1 %vm1765_vm4, %v3542_v31 }
 0xd24   : > { %4904 = vmatmul.mubr.msk.f32.vlgmr.msra.gmra.mrb[88].mxu1 %vm1765_vm4, %v4889_v32 }
 0xd25   : > { %v4892_v34 = vpop.f32.mrb[82].mxu1 }
 0xd26   : > { %v3552_v36 = vpop.f32.mrb[83].mxu1 }
 0xd27   : > { %4906 = vmatprep.mubr.msk.f32.mxu1 %vm1765_vm4, %v3552_v36 }
 0xd28   : > { %4907 = vmatmul.mubr.msk.f32.gmra.mrb[90].mxu1 %vm1765_vm4, %v4892_v34 }
 0xd29   : > { %v4895_v38 = vpop.f32.mrb[84].mxu1 }
 0xd2a   : > { %v3562_v40 = vpop.f32.mrb[85].mxu1 }
 0xd2b   : > { %4909 = vmatprep.mubr.msk.f32.mxu1 %vm1765_vm4, %v3562_v40 }
 0xd2c   : > { %4910 = vmatmul.mubr.msk.f32.gmra.mrb[92].mxu1 %vm1765_vm4, %v4895_v38 }
 0xd2d   : > { %v4898_v42 = vpop.f32.mrb[86].mxu1 }
 0xd2e   : > { %v3572_v37 = vpop.f32.mrb[87].mxu1 }
 0xd2f   : > { %4912 = vmatprep.mubr.msk.f32.mxu1 %vm1765_vm4, %v3572_v37 }
 0xd30   : > { %4913 = vmatmul.mubr.msk.f32.gmra.mrb[94].mxu1 %vm1765_vm4, %v4898_v42 }
 0xdf7   : > { %v4905_v27 = vpop.f32.mrb[88].mxu1 }
 0xdf8   : > { %v3711_v41 = vmul.f32 %v4905_v27, %v5890_v25  ;;  %v3671_v43 = vpop.f32.mrb[89].mxu1 }
 0xdf9   : > { %v3710_v48 = vmul.f32 %v3671_v43, %v5890_v25 }
 0xdfa   : > { %v3719_v50 = vadd.f32 %v6007_v14, %v3711_v41 }
 0xdfb   : > { %v3718_v8 = vadd.f32 %v6002_v46, %v3710_v48  ;;  %v4908_v6 = vpop.f32.mrb[90].mxu1 }
 0xdfc   : > { %4064 = vst.msk [vmem:[%s5898_s14 + $0xc8] sm:$0xff] %vm303_vm0, %v3719_v50  ;;  %v3713_v33 = vmul.f32 %v4908_v6, %v5890_v25  ;;  %v3681_v53 = vpop.f32.mrb[91].mxu1 }
 0xdfd   : > { %4063 = vst.msk [vmem:[%s5898_s14 + $0xc0] sm:$0xff] %vm303_vm0, %v3718_v8  ;;  %v3712_v55 = vmul.f32 %v3681_v53, %v5890_v25 }
 0xdfe   : > { %v3721_v57 = vadd.f32 %v6019_v58, %v3713_v33 }
 0xdff   : > { %v3720_v59 = vadd.f32 %v6013_v49, %v3712_v55  ;;  %v4911_v60 = vpop.f32.mrb[92].mxu1 }
 0xe00   : > { %4066 = vst.msk [vmem:[%s5898_s14 + $0xd8] sm:$0xff] %vm303_vm0, %v3721_v57  ;;  %v3715_v46 = vmul.f32 %v4911_v60, %v5890_v25  ;;  %v3691_v14 = vpop.f32.mrb[93].mxu1 }
 0xe01   : > { %4065 = vst.msk [vmem:[%s5898_s14 + $0xd0] sm:$0xff] %vm303_vm0, %v3720_v59  ;;  %v3714_v52 = vmul.f32 %v3691_v14, %v5890_v25 }
 0xe02   : > { %v3723_v51 = vadd.f32 %v6031_v16, %v3715_v46 }
 0xe03   : > { %v3722_v54 = vadd.f32 %v6025_v47, %v3714_v52  ;;  %v4914_v19 = vpop.f32.mrb[94].mxu1 }
 0xe04   : > { %4068 = vst.msk [vmem:[%s5898_s14 + $0xe8] sm:$0xff] %vm303_vm0, %v3723_v51  ;;  %v3717_v49 = vmul.f32 %v4914_v19, %v5890_v25  ;;  %v3701_v58 = vpop.f32.mrb[95].mxu1 }
 0xe05   : > { %4067 = vst.msk [vmem:[%s5898_s14 + $0xe0] sm:$0xff] %vm303_vm0, %v3722_v54  ;;  %v3716_v62 = vmul.f32 %v3701_v58, %v5890_v25 }
 0xe06   : > { %v3725_v63 = vadd.f32 %v6043_v18, %v3717_v49 }
 0xe07   : > { %v3724_v7 = vadd.f32 %v6037_v61, %v3716_v62 }
 0xe08   : > { %4070 = vst.msk [vmem:[%s5898_s14 + $0xf8] sm:$0xff] %vm303_vm0, %v3725_v63 }
 0xe09   : > { %4069 = vst.msk [vmem:[%s5898_s14 + $0xf0] sm:$0xff] %vm303_vm0, %v3724_v7 }
 0xe0a PF: > { %s17_s23 = sadd.s32 1, %s5356_s23  }
 0xe0b   : > { %p14_p4 = scmp.ge.s32.totalorder %s17_s23, 4  }
 0xe0d   :  { %16 = sbr.rel (!%p14_p4) target bundleno = 2 (0x2), region = 80 }

</bundles_post_ra>
